<compile_context>
chip_gen: v6e
topology: v6e:2x2x1
jax: 0.10.0
libtpu: 0.0.40
codegen_flags: <defaults>
</compile_context>

<pallas_src>
import jax
import jax.numpy as jnp
import numpy as np
from jax.experimental import pallas as pl
from jax.experimental.pallas import tpu as pltpu

_CHS = (16, 32, 64, 128)   # fixed by the module definition


# ---------------------------------------------------------------------------
# Fused Pallas kernel: conv stack + linear + sigmoid, all resident in VMEM
# ---------------------------------------------------------------------------
def _disc_fused_kernel(*refs):
    """refs: x, 4 x (G_stack, W_flat, bias, shift), fc_w, fc_b | out | 4 x im2col scratch."""
    x_ref = refs[0]
    layer_refs = [refs[1 + 4 * i: 1 + 4 * i + 4] for i in range(4)]
    fcw_ref, fcb_ref = refs[17], refs[18]
    o_ref = refs[19]
    im_refs = refs[20:24]

    cur = x_ref[0]                                           # (HW, Cin) f32, this sample
    for (g_ref, w_ref, b_ref, sh_ref), im_ref in zip(layer_refs, im_refs):
        howo, nine_cin = im_ref.shape
        cin = nine_cin // 9
        howo_pad = g_ref.shape[0] // 9                       # 8-aligned per-tap row block

        # Stage 1: ONE stacked gather matmul -> all 9 taps' patches at once.
        patches = jnp.dot(g_ref[...], cur.astype(jnp.bfloat16),
                          preferred_element_type=jnp.float32)        # (9*HoWo_pad, Cin)

        # Scatter the 9 tap row-blocks into the (HoWo, 9*Cin) im2col scratch
        # (static slice stores; gather values are exact in bf16).
        for t in range(9):
            im_ref[:, t * cin:(t + 1) * cin] = (
                patches[t * howo_pad:t * howo_pad + howo, :].astype(jnp.bfloat16))

        # Stage 2: ONE wide-K weight matmul (BatchNorm scale folded host-side).
        z = jnp.dot(im_ref[...], w_ref[...],
                    preferred_element_type=jnp.float32)               # (HoWo, Cout)
        z = z + b_ref[...]                                            # bias (BN-scaled)
        z = jnp.maximum(z, 0.2 * z)                                   # LeakyReLU(0.2)
        # TODO(synk): Dropout2d(0.25) is identity in eval mode (training not implemented).
        cur = z + sh_ref[...]                                         # folded BN shift

    # Linear(128*ds*ds -> 1) + numerically-stable sigmoid.  fc_w is pre-permuted
    # host-side to (ds*ds, 128) NHWC order -> no in-kernel transpose/reshape.
    logit = jnp.sum(cur * fcw_ref[...], axis=1, keepdims=True)        # (ds*ds, 1)
    logit = jnp.sum(logit, axis=0, keepdims=True) + fcb_ref[...]      # (1, 1)
    o_ref[0] = 0.5 * (jnp.tanh(0.5 * logit) + 1.0)                    # stable sigmoid


# ---------------------------------------------------------------------------
# Host-side construction of the stacked stride-2 / pad-1 im2col gather matrix
# ---------------------------------------------------------------------------
def _build_gather_stack(h, w):
    """G[t*HoWo_pad + (oh*Wo+ow), r*W+c] = 1 iff tap t of output (oh,ow) reads input (r,c)."""
    ho = (h - 1) // 2 + 1
    wo = (w - 1) // 2 + 1
    howo = ho * wo
    howo_pad = -(-howo // 8) * 8                 # pad each tap's row block to 8 sublanes
    g = np.zeros((9, howo_pad, h * w), np.float32)
    for ky in range(3):
        for kx in range(3):
            t = ky * 3 + kx
            for oh in range(ho):
                r = 2 * oh + ky - 1
                if not (0 <= r < h):
                    continue
                for ow in range(wo):
                    c = 2 * ow + kx - 1
                    if 0 <= c < w:
                        g[t, oh * wo + ow, r * w + c] = 1.0
    return g.reshape(9 * howo_pad, h * w), ho, wo


# ---------------------------------------------------------------------------
# Parameter construction (deterministic; all layout transforms hoisted here)
# ---------------------------------------------------------------------------
def init_params(key, channels, img_size):
    params = {}
    chs = [channels] + list(_CHS)
    keys = jax.random.split(key, 10)
    h = w = img_size
    for i in range(4):
        cin, cout = chs[i], chs[i + 1]
        bound = 1.0 / float(np.sqrt(cin * 9))
        w_oihw = jax.random.uniform(keys[2 * i], (cout, cin, 3, 3), jnp.float32, -bound, bound)
        b = jax.random.uniform(keys[2 * i + 1], (cout,), jnp.float32, -bound, bound)

        if i > 0:
            # nn.BatchNorm2d(cout, 0.8): eps=0.8, gamma=1, beta=0, running (mean,var)=(0,1)
            eps = 0.8
            gamma = jnp.ones((cout,), jnp.float32)
            beta = jnp.zeros((cout,), jnp.float32)
            rmean = jnp.zeros((cout,), jnp.float32)
            rvar = jnp.ones((cout,), jnp.float32)
            scale = gamma / jnp.sqrt(rvar + eps)   # > 0 : required to fold through LeakyReLU
            shift = beta - rmean * scale
        else:
            scale = jnp.ones((cout,), jnp.float32)
            shift = jnp.zeros((cout,), jnp.float32)

        # (Cout,Cin,3,3) -> (ky,kx,Cin,Cout) -> single wide-K (9*Cin, Cout) matrix,
        # tap index t = ky*3+kx matching the im2col column layout; BN scale folded in.
        w_flat = jnp.transpose(w_oihw, (2, 3, 1, 0)).reshape(9 * cin, cout) * scale[None, :]
        g_stack, ho, wo = _build_gather_stack(h, w)
        params[f"g{i}"] = jnp.asarray(g_stack, jnp.bfloat16)          # 0/1 exact in bf16
        params[f"w{i}"] = w_flat.astype(jnp.bfloat16)
        params[f"b{i}"] = (b * scale).reshape(1, cout)                # f32
        params[f"shift{i}"] = shift.reshape(1, cout)                  # f32
        h, w = ho, wo

    ds = img_size // (2 ** 4)
    lin_in = 128 * ds * ds
    bound = 1.0 / float(np.sqrt(lin_in))
    fc_w = jax.random.uniform(keys[8], (lin_in, 1), jnp.float32, -bound, bound)
    fc_b = jax.random.uniform(keys[9], (1,), jnp.float32, -bound, bound)
    # PyTorch flattens NCHW (index = c*ds*ds + p); re-lay out rows as (p, c) so the
    # kernel consumes the NHWC feature map directly (no in-kernel transpose).
    params["fc_w"] = jnp.transpose(fc_w.reshape(128, ds * ds), (1, 0))   # (ds*ds, 128)
    params["fc_b"] = fc_b.reshape(1, 1)
    return params


# ---------------------------------------------------------------------------
# Full forward pass: one pallas_call, batch on a parallel grid axis
# ---------------------------------------------------------------------------
def discriminator_forward(params, img_nchw):
    n, c, h, w = img_nchw.shape
    x = jnp.transpose(img_nchw, (0, 2, 3, 1)).reshape(n, h * w, c)   # NCHW -> NHWC-flat

    operands = [x]
    in_specs = [pl.BlockSpec((1, h * w, c), lambda b: (b, 0, 0))]
    scratch_shapes = []
    hh, ww, cin = h, w, c
    for i in range(4):
        for name in (f"g{i}", f"w{i}", f"b{i}", f"shift{i}"):
            arr = params[name]
            operands.append(arr)
            in_specs.append(pl.BlockSpec(arr.shape, lambda b: (0, 0)))   # fetched once
        ho, wo = (hh - 1) // 2 + 1, (ww - 1) // 2 + 1
        scratch_shapes.append(pltpu.VMEM((ho * wo, 9 * cin), jnp.bfloat16))
        hh, ww, cin = ho, wo, _CHS[i]
    for name in ("fc_w", "fc_b"):
        arr = params[name]
        operands.append(arr)
        in_specs.append(pl.BlockSpec(arr.shape, lambda b: (0, 0)))

    out = pl.pallas_call(
        _disc_fused_kernel,
        grid=(n,),
        out_shape=jax.ShapeDtypeStruct((n, 1, 1), jnp.float32),
        in_specs=in_specs,
        out_specs=pl.BlockSpec((1, 1, 1), lambda b: (b, 0, 0)),
        scratch_shapes=scratch_shapes,
        compiler_params=pltpu.CompilerParams(dimension_semantics=("parallel",)),
    )(*operands)
    return out.reshape(n, 1)


if __name__ == "__main__":
    key = jax.random.PRNGKey(0)
    pkey, xkey = jax.random.split(key)

    batch, channels, img_size = 2, 4, 16   # opt.channels=4, opt.img_size=16
    params = init_params(pkey, channels, img_size)
    img = jax.random.normal(xkey, (batch, channels, img_size, img_size), jnp.float32)

    validity = jax.jit(discriminator_forward)(params, img)
    jax.block_until_ready(validity)

    assert validity.shape == (batch, 1), validity.shape
    assert validity.dtype == jnp.float32
    assert bool(jnp.all(jnp.isfinite(validity)))
    assert bool(jnp.all((validity >= 0.0) & (validity <= 1.0)))
    print("KERNEL_OK")
</pallas_src>

<mosaic_0001>
module attributes {stable_mosaic.version = 11 : i64} {
  func.func @_disc_fused_kernel(%arg0: i32, %arg1: memref<1x256x4xf32, #tpu.memory_space<vmem>>, %arg2: memref<576x256xbf16, #tpu.memory_space<vmem>>, %arg3: memref<36x16xbf16, #tpu.memory_space<vmem>>, %arg4: memref<1x16xf32, #tpu.memory_space<vmem>>, %arg5: memref<1x16xf32, #tpu.memory_space<vmem>>, %arg6: memref<144x64xbf16, #tpu.memory_space<vmem>>, %arg7: memref<144x32xbf16, #tpu.memory_space<vmem>>, %arg8: memref<1x32xf32, #tpu.memory_space<vmem>>, %arg9: memref<1x32xf32, #tpu.memory_space<vmem>>, %arg10: memref<72x16xbf16, #tpu.memory_space<vmem>>, %arg11: memref<288x64xbf16, #tpu.memory_space<vmem>>, %arg12: memref<1x64xf32, #tpu.memory_space<vmem>>, %arg13: memref<1x64xf32, #tpu.memory_space<vmem>>, %arg14: memref<72x4xbf16, #tpu.memory_space<vmem>>, %arg15: memref<576x128xbf16, #tpu.memory_space<vmem>>, %arg16: memref<1x128xf32, #tpu.memory_space<vmem>>, %arg17: memref<1x128xf32, #tpu.memory_space<vmem>>, %arg18: memref<1x128xf32, #tpu.memory_space<vmem>>, %arg19: memref<1x1xf32, #tpu.memory_space<vmem>>, %arg20: memref<1x1x1xf32, #tpu.memory_space<vmem>>, %arg21: memref<64x36xbf16, #tpu.memory_space<vmem>>, %arg22: memref<16x144xbf16, #tpu.memory_space<vmem>>, %arg23: memref<4x288xbf16, #tpu.memory_space<vmem>>, %arg24: memref<1x576xbf16, #tpu.memory_space<vmem>>) attributes {dimension_semantics = [#tpu.dimension_semantics<parallel>], iteration_bounds = array<i64: 2>, scalar_prefetch = 0 : i64, scratch_operands = 4 : i64, tpu.core_type = #tpu.core_type<tc>, window_params = [{transform_indices = @transform_0, window_bounds = array<i64: 1, 256, 4>}, {pipeline_mode = #tpu.pipeline_mode<synchronous>, transform_indices = @transform_1, window_bounds = array<i64: 576, 256>}, {pipeline_mode = #tpu.pipeline_mode<synchronous>, transform_indices = @transform_2, window_bounds = array<i64: 36, 16>}, {pipeline_mode = #tpu.pipeline_mode<synchronous>, transform_indices = @transform_3, window_bounds = array<i64: 1, 16>}, {pipeline_mode = #tpu.pipeline_mode<synchronous>, transform_indices = @transform_4, window_bounds = array<i64: 1, 16>}, {pipeline_mode = #tpu.pipeline_mode<synchronous>, transform_indices = @transform_5, window_bounds = array<i64: 144, 64>}, {pipeline_mode = #tpu.pipeline_mode<synchronous>, transform_indices = @transform_6, window_bounds = array<i64: 144, 32>}, {pipeline_mode = #tpu.pipeline_mode<synchronous>, transform_indices = @transform_7, window_bounds = array<i64: 1, 32>}, {pipeline_mode = #tpu.pipeline_mode<synchronous>, transform_indices = @transform_8, window_bounds = array<i64: 1, 32>}, {pipeline_mode = #tpu.pipeline_mode<synchronous>, transform_indices = @transform_9, window_bounds = array<i64: 72, 16>}, {pipeline_mode = #tpu.pipeline_mode<synchronous>, transform_indices = @transform_10, window_bounds = array<i64: 288, 64>}, {pipeline_mode = #tpu.pipeline_mode<synchronous>, transform_indices = @transform_11, window_bounds = array<i64: 1, 64>}, {pipeline_mode = #tpu.pipeline_mode<synchronous>, transform_indices = @transform_12, window_bounds = array<i64: 1, 64>}, {pipeline_mode = #tpu.pipeline_mode<synchronous>, transform_indices = @transform_13, window_bounds = array<i64: 72, 4>}, {pipeline_mode = #tpu.pipeline_mode<synchronous>, transform_indices = @transform_14, window_bounds = array<i64: 576, 128>}, {pipeline_mode = #tpu.pipeline_mode<synchronous>, transform_indices = @transform_15, window_bounds = array<i64: 1, 128>}, {pipeline_mode = #tpu.pipeline_mode<synchronous>, transform_indices = @transform_16, window_bounds = array<i64: 1, 128>}, {pipeline_mode = #tpu.pipeline_mode<synchronous>, transform_indices = @transform_17, window_bounds = array<i64: 1, 128>}, {pipeline_mode = #tpu.pipeline_mode<synchronous>, transform_indices = @transform_18, window_bounds = array<i64: 1, 1>}, {transform_indices = @transform_19, window_bounds = array<i64: 1, 1, 1>}]} {
    %c0 = arith.constant 0 : index
    %c0_0 = arith.constant 0 : index
    %c0_1 = arith.constant 0 : index
    %0 = vector.load %arg1[%c0, %c0_0, %c0_1] : memref<1x256x4xf32, #tpu.memory_space<vmem>>, vector<1x256x4xf32>
    %1 = vector.shape_cast %0 : vector<1x256x4xf32> to vector<256x4xf32>
    %c0_2 = arith.constant 0 : index
    %c0_3 = arith.constant 0 : index
    %2 = vector.load %arg2[%c0_2, %c0_3] : memref<576x256xbf16, #tpu.memory_space<vmem>>, vector<576x256xbf16>
    %3 = arith.truncf %1 : vector<256x4xf32> to vector<256x4xbf16>
    %cst = arith.constant dense<0.000000e+00> : vector<576x4xf32>
    %4 = tpu.matmul %2, %3, %cst {dimension_numbers = #tpu.dot_dimension_numbers<[1], [0], [0], [1], [0, 0, 1, 1], [], []>} : vector<576x256xbf16>, vector<256x4xbf16>, vector<576x4xf32> -> vector<576x4xf32>
    %5 = vector.extract_strided_slice %4 {offsets = [0, 0], sizes = [64, 4], strides = [1, 1]} : vector<576x4xf32> to vector<64x4xf32>
    %6 = arith.truncf %5 : vector<64x4xf32> to vector<64x4xbf16>
    %c0_4 = arith.constant 0 : index
    %c0_5 = arith.constant 0 : index
    %7 = vector.load %arg21[%c0_4, %c0_5] : memref<64x36xbf16, #tpu.memory_space<vmem>>, vector<64x4xbf16>
    tpu.vector_store %arg21[%c0_4, %c0_5], %6 {strides = array<i32>} : memref<64x36xbf16, #tpu.memory_space<vmem>>, vector<64x4xbf16>,
    %8 = vector.extract_strided_slice %4 {offsets = [64, 0], sizes = [64, 4], strides = [1, 1]} : vector<576x4xf32> to vector<64x4xf32>
    %9 = arith.truncf %8 : vector<64x4xf32> to vector<64x4xbf16>
    %c0_6 = arith.constant 0 : index
    %c4 = arith.constant 4 : index
    %10 = vector.load %arg21[%c0_6, %c4] : memref<64x36xbf16, #tpu.memory_space<vmem>>, vector<64x4xbf16>
    tpu.vector_store %arg21[%c0_6, %c4], %9 {strides = array<i32>} : memref<64x36xbf16, #tpu.memory_space<vmem>>, vector<64x4xbf16>,
    %11 = vector.extract_strided_slice %4 {offsets = [128, 0], sizes = [64, 4], strides = [1, 1]} : vector<576x4xf32> to vector<64x4xf32>
    %12 = arith.truncf %11 : vector<64x4xf32> to vector<64x4xbf16>
    %c0_7 = arith.constant 0 : index
    %c8 = arith.constant 8 : index
    %13 = vector.load %arg21[%c0_7, %c8] : memref<64x36xbf16, #tpu.memory_space<vmem>>, vector<64x4xbf16>
    tpu.vector_store %arg21[%c0_7, %c8], %12 {strides = array<i32>} : memref<64x36xbf16, #tpu.memory_space<vmem>>, vector<64x4xbf16>,
    %14 = vector.extract_strided_slice %4 {offsets = [192, 0], sizes = [64, 4], strides = [1, 1]} : vector<576x4xf32> to vector<64x4xf32>
    %15 = arith.truncf %14 : vector<64x4xf32> to vector<64x4xbf16>
    %c0_8 = arith.constant 0 : index
    %c12 = arith.constant 12 : index
    %16 = vector.load %arg21[%c0_8, %c12] : memref<64x36xbf16, #tpu.memory_space<vmem>>, vector<64x4xbf16>
    tpu.vector_store %arg21[%c0_8, %c12], %15 {strides = array<i32>} : memref<64x36xbf16, #tpu.memory_space<vmem>>, vector<64x4xbf16>,
    %17 = vector.extract_strided_slice %4 {offsets = [256, 0], sizes = [64, 4], strides = [1, 1]} : vector<576x4xf32> to vector<64x4xf32>
    %18 = arith.truncf %17 : vector<64x4xf32> to vector<64x4xbf16>
    %c0_9 = arith.constant 0 : index
    %c16 = arith.constant 16 : index
    %19 = vector.load %arg21[%c0_9, %c16] : memref<64x36xbf16, #tpu.memory_space<vmem>>, vector<64x4xbf16>
    tpu.vector_store %arg21[%c0_9, %c16], %18 {strides = array<i32>} : memref<64x36xbf16, #tpu.memory_space<vmem>>, vector<64x4xbf16>,
    %20 = vector.extract_strided_slice %4 {offsets = [320, 0], sizes = [64, 4], strides = [1, 1]} : vector<576x4xf32> to vector<64x4xf32>
    %21 = arith.truncf %20 : vector<64x4xf32> to vector<64x4xbf16>
    %c0_10 = arith.constant 0 : index
    %c20 = arith.constant 20 : index
    %22 = vector.load %arg21[%c0_10, %c20] : memref<64x36xbf16, #tpu.memory_space<vmem>>, vector<64x4xbf16>
    tpu.vector_store %arg21[%c0_10, %c20], %21 {strides = array<i32>} : memref<64x36xbf16, #tpu.memory_space<vmem>>, vector<64x4xbf16>,
    %23 = vector.extract_strided_slice %4 {offsets = [384, 0], sizes = [64, 4], strides = [1, 1]} : vector<576x4xf32> to vector<64x4xf32>
    %24 = arith.truncf %23 : vector<64x4xf32> to vector<64x4xbf16>
    %c0_11 = arith.constant 0 : index
    %c24 = arith.constant 24 : index
    %25 = vector.load %arg21[%c0_11, %c24] : memref<64x36xbf16, #tpu.memory_space<vmem>>, vector<64x4xbf16>
    tpu.vector_store %arg21[%c0_11, %c24], %24 {strides = array<i32>} : memref<64x36xbf16, #tpu.memory_space<vmem>>, vector<64x4xbf16>,
    %26 = vector.extract_strided_slice %4 {offsets = [448, 0], sizes = [64, 4], strides = [1, 1]} : vector<576x4xf32> to vector<64x4xf32>
    %27 = arith.truncf %26 : vector<64x4xf32> to vector<64x4xbf16>
    %c0_12 = arith.constant 0 : index
    %c28 = arith.constant 28 : index
    %28 = vector.load %arg21[%c0_12, %c28] : memref<64x36xbf16, #tpu.memory_space<vmem>>, vector<64x4xbf16>
    tpu.vector_store %arg21[%c0_12, %c28], %27 {strides = array<i32>} : memref<64x36xbf16, #tpu.memory_space<vmem>>, vector<64x4xbf16>,
    %29 = vector.extract_strided_slice %4 {offsets = [512, 0], sizes = [64, 4], strides = [1, 1]} : vector<576x4xf32> to vector<64x4xf32>
    %30 = arith.truncf %29 : vector<64x4xf32> to vector<64x4xbf16>
    %c0_13 = arith.constant 0 : index
    %c32 = arith.constant 32 : index
    %31 = vector.load %arg21[%c0_13, %c32] : memref<64x36xbf16, #tpu.memory_space<vmem>>, vector<64x4xbf16>
    tpu.vector_store %arg21[%c0_13, %c32], %30 {strides = array<i32>} : memref<64x36xbf16, #tpu.memory_space<vmem>>, vector<64x4xbf16>,
    %c0_14 = arith.constant 0 : index
    %c0_15 = arith.constant 0 : index
    %32 = vector.load %arg21[%c0_14, %c0_15] : memref<64x36xbf16, #tpu.memory_space<vmem>>, vector<64x36xbf16>
    %c0_16 = arith.constant 0 : index
    %c0_17 = arith.constant 0 : index
    %33 = vector.load %arg3[%c0_16, %c0_17] : memref<36x16xbf16, #tpu.memory_space<vmem>>, vector<36x16xbf16>
    %cst_18 = arith.constant dense<0.000000e+00> : vector<64x16xf32>
    %34 = tpu.matmul %32, %33, %cst_18 {dimension_numbers = #tpu.dot_dimension_numbers<[1], [0], [0], [1], [0, 0, 1, 1], [], []>} : vector<64x36xbf16>, vector<36x16xbf16>, vector<64x16xf32> -> vector<64x16xf32>
    %c0_19 = arith.constant 0 : index
    %c0_20 = arith.constant 0 : index
    %35 = vector.load %arg4[%c0_19, %c0_20] : memref<1x16xf32, #tpu.memory_space<vmem>>, vector<1x16xf32>
    %36 = vector.broadcast %35 : vector<1x16xf32> to vector<64x16xf32>
    %37 = arith.addf %34, %36 : vector<64x16xf32>
    %cst_21 = arith.constant 2.000000e-01 : f32
    %38 = vector.broadcast %cst_21 : f32 to vector<64x16xf32>
    %39 = arith.mulf %38, %37 : vector<64x16xf32>
    %40 = arith.maximumf %37, %39 : vector<64x16xf32>
    %c0_22 = arith.constant 0 : index
    %c0_23 = arith.constant 0 : index
    %41 = vector.load %arg5[%c0_22, %c0_23] : memref<1x16xf32, #tpu.memory_space<vmem>>, vector<1x16xf32>
    %42 = vector.broadcast %41 : vector<1x16xf32> to vector<64x16xf32>
    %43 = arith.addf %40, %42 : vector<64x16xf32>
    %c0_24 = arith.constant 0 : index
    %c0_25 = arith.constant 0 : index
    %44 = vector.load %arg6[%c0_24, %c0_25] : memref<144x64xbf16, #tpu.memory_space<vmem>>, vector<144x64xbf16>
    %45 = arith.truncf %43 : vector<64x16xf32> to vector<64x16xbf16>
    %cst_26 = arith.constant dense<0.000000e+00> : vector<144x16xf32>
    %46 = tpu.matmul %44, %45, %cst_26 {dimension_numbers = #tpu.dot_dimension_numbers<[1], [0], [0], [1], [0, 0, 1, 1], [], []>} : vector<144x64xbf16>, vector<64x16xbf16>, vector<144x16xf32> -> vector<144x16xf32>
    %47 = vector.extract_strided_slice %46 {offsets = [0, 0], sizes = [16, 16], strides = [1, 1]} : vector<144x16xf32> to vector<16x16xf32>
    %48 = arith.truncf %47 : vector<16x16xf32> to vector<16x16xbf16>
    %c0_27 = arith.constant 0 : index
    %c0_28 = arith.constant 0 : index
    %49 = vector.load %arg22[%c0_27, %c0_28] : memref<16x144xbf16, #tpu.memory_space<vmem>>, vector<16x16xbf16>
    tpu.vector_store %arg22[%c0_27, %c0_28], %48 {strides = array<i32>} : memref<16x144xbf16, #tpu.memory_space<vmem>>, vector<16x16xbf16>,
    %50 = vector.extract_strided_slice %46 {offsets = [16, 0], sizes = [16, 16], strides = [1, 1]} : vector<144x16xf32> to vector<16x16xf32>
    %51 = arith.truncf %50 : vector<16x16xf32> to vector<16x16xbf16>
    %c0_29 = arith.constant 0 : index
    %c16_30 = arith.constant 16 : index
    %52 = vector.load %arg22[%c0_29, %c16_30] : memref<16x144xbf16, #tpu.memory_space<vmem>>, vector<16x16xbf16>
    tpu.vector_store %arg22[%c0_29, %c16_30], %51 {strides = array<i32>} : memref<16x144xbf16, #tpu.memory_space<vmem>>, vector<16x16xbf16>,
    %53 = vector.extract_strided_slice %46 {offsets = [32, 0], sizes = [16, 16], strides = [1, 1]} : vector<144x16xf32> to vector<16x16xf32>
    %54 = arith.truncf %53 : vector<16x16xf32> to vector<16x16xbf16>
    %c0_31 = arith.constant 0 : index
    %c32_32 = arith.constant 32 : index
    %55 = vector.load %arg22[%c0_31, %c32_32] : memref<16x144xbf16, #tpu.memory_space<vmem>>, vector<16x16xbf16>
    tpu.vector_store %arg22[%c0_31, %c32_32], %54 {strides = array<i32>} : memref<16x144xbf16, #tpu.memory_space<vmem>>, vector<16x16xbf16>,
    %56 = vector.extract_strided_slice %46 {offsets = [48, 0], sizes = [16, 16], strides = [1, 1]} : vector<144x16xf32> to vector<16x16xf32>
    %57 = arith.truncf %56 : vector<16x16xf32> to vector<16x16xbf16>
    %c0_33 = arith.constant 0 : index
    %c48 = arith.constant 48 : index
    %58 = vector.load %arg22[%c0_33, %c48] : memref<16x144xbf16, #tpu.memory_space<vmem>>, vector<16x16xbf16>
    tpu.vector_store %arg22[%c0_33, %c48], %57 {strides = array<i32>} : memref<16x144xbf16, #tpu.memory_space<vmem>>, vector<16x16xbf16>,
    %59 = vector.extract_strided_slice %46 {offsets = [64, 0], sizes = [16, 16], strides = [1, 1]} : vector<144x16xf32> to vector<16x16xf32>
    %60 = arith.truncf %59 : vector<16x16xf32> to vector<16x16xbf16>
    %c0_34 = arith.constant 0 : index
    %c64 = arith.constant 64 : index
    %61 = vector.load %arg22[%c0_34, %c64] : memref<16x144xbf16, #tpu.memory_space<vmem>>, vector<16x16xbf16>
    tpu.vector_store %arg22[%c0_34, %c64], %60 {strides = array<i32>} : memref<16x144xbf16, #tpu.memory_space<vmem>>, vector<16x16xbf16>,
    %62 = vector.extract_strided_slice %46 {offsets = [80, 0], sizes = [16, 16], strides = [1, 1]} : vector<144x16xf32> to vector<16x16xf32>
    %63 = arith.truncf %62 : vector<16x16xf32> to vector<16x16xbf16>
    %c0_35 = arith.constant 0 : index
    %c80 = arith.constant 80 : index
    %64 = vector.load %arg22[%c0_35, %c80] : memref<16x144xbf16, #tpu.memory_space<vmem>>, vector<16x16xbf16>
    tpu.vector_store %arg22[%c0_35, %c80], %63 {strides = array<i32>} : memref<16x144xbf16, #tpu.memory_space<vmem>>, vector<16x16xbf16>,
    %65 = vector.extract_strided_slice %46 {offsets = [96, 0], sizes = [16, 16], strides = [1, 1]} : vector<144x16xf32> to vector<16x16xf32>
    %66 = arith.truncf %65 : vector<16x16xf32> to vector<16x16xbf16>
    %c0_36 = arith.constant 0 : index
    %c96 = arith.constant 96 : index
    %67 = vector.load %arg22[%c0_36, %c96] : memref<16x144xbf16, #tpu.memory_space<vmem>>, vector<16x16xbf16>
    tpu.vector_store %arg22[%c0_36, %c96], %66 {strides = array<i32>} : memref<16x144xbf16, #tpu.memory_space<vmem>>, vector<16x16xbf16>,
    %68 = vector.extract_strided_slice %46 {offsets = [112, 0], sizes = [16, 16], strides = [1, 1]} : vector<144x16xf32> to vector<16x16xf32>
    %69 = arith.truncf %68 : vector<16x16xf32> to vector<16x16xbf16>
    %c0_37 = arith.constant 0 : index
    %c112 = arith.constant 112 : index
    %70 = vector.load %arg22[%c0_37, %c112] : memref<16x144xbf16, #tpu.memory_space<vmem>>, vector<16x16xbf16>
    tpu.vector_store %arg22[%c0_37, %c112], %69 {strides = array<i32>} : memref<16x144xbf16, #tpu.memory_space<vmem>>, vector<16x16xbf16>,
    %71 = vector.extract_strided_slice %46 {offsets = [128, 0], sizes = [16, 16], strides = [1, 1]} : vector<144x16xf32> to vector<16x16xf32>
    %72 = arith.truncf %71 : vector<16x16xf32> to vector<16x16xbf16>
    %c0_38 = arith.constant 0 : index
    %c128 = arith.constant 128 : index
    %73 = vector.load %arg22[%c0_38, %c128] : memref<16x144xbf16, #tpu.memory_space<vmem>>, vector<16x16xbf16>
    tpu.vector_store %arg22[%c0_38, %c128], %72 {strides = array<i32>} : memref<16x144xbf16, #tpu.memory_space<vmem>>, vector<16x16xbf16>,
    %c0_39 = arith.constant 0 : index
    %c0_40 = arith.constant 0 : index
    %74 = vector.load %arg22[%c0_39, %c0_40] : memref<16x144xbf16, #tpu.memory_space<vmem>>, vector<16x144xbf16>
    %c0_41 = arith.constant 0 : index
    %c0_42 = arith.constant 0 : index
    %75 = vector.load %arg7[%c0_41, %c0_42] : memref<144x32xbf16, #tpu.memory_space<vmem>>, vector<144x32xbf16>
    %cst_43 = arith.constant dense<0.000000e+00> : vector<16x32xf32>
    %76 = tpu.matmul %74, %75, %cst_43 {dimension_numbers = #tpu.dot_dimension_numbers<[1], [0], [0], [1], [0, 0, 1, 1], [], []>} : vector<16x144xbf16>, vector<144x32xbf16>, vector<16x32xf32> -> vector<16x32xf32>
    %c0_44 = arith.constant 0 : index
    %c0_45 = arith.constant 0 : index
    %77 = vector.load %arg8[%c0_44, %c0_45] : memref<1x32xf32, #tpu.memory_space<vmem>>, vector<1x32xf32>
    %78 = vector.broadcast %77 : vector<1x32xf32> to vector<16x32xf32>
    %79 = arith.addf %76, %78 : vector<16x32xf32>
    %cst_46 = arith.constant 2.000000e-01 : f32
    %80 = vector.broadcast %cst_46 : f32 to vector<16x32xf32>
    %81 = arith.mulf %80, %79 : vector<16x32xf32>
    %82 = arith.maximumf %79, %81 : vector<16x32xf32>
    %c0_47 = arith.constant 0 : index
    %c0_48 = arith.constant 0 : index
    %83 = vector.load %arg9[%c0_47, %c0_48] : memref<1x32xf32, #tpu.memory_space<vmem>>, vector<1x32xf32>
    %84 = vector.broadcast %83 : vector<1x32xf32> to vector<16x32xf32>
    %85 = arith.addf %82, %84 : vector<16x32xf32>
    %c0_49 = arith.constant 0 : index
    %c0_50 = arith.constant 0 : index
    %86 = vector.load %arg10[%c0_49, %c0_50] : memref<72x16xbf16, #tpu.memory_space<vmem>>, vector<72x16xbf16>
    %87 = arith.truncf %85 : vector<16x32xf32> to vector<16x32xbf16>
    %cst_51 = arith.constant dense<0.000000e+00> : vector<72x32xf32>
    %88 = tpu.matmul %86, %87, %cst_51 {dimension_numbers = #tpu.dot_dimension_numbers<[1], [0], [0], [1], [0, 0, 1, 1], [], []>} : vector<72x16xbf16>, vector<16x32xbf16>, vector<72x32xf32> -> vector<72x32xf32>
    %89 = vector.extract_strided_slice %88 {offsets = [0, 0], sizes = [4, 32], strides = [1, 1]} : vector<72x32xf32> to vector<4x32xf32>
    %90 = arith.truncf %89 : vector<4x32xf32> to vector<4x32xbf16>
    %c0_52 = arith.constant 0 : index
    %c0_53 = arith.constant 0 : index
    %91 = vector.load %arg23[%c0_52, %c0_53] : memref<4x288xbf16, #tpu.memory_space<vmem>>, vector<4x32xbf16>
    tpu.vector_store %arg23[%c0_52, %c0_53], %90 {strides = array<i32>} : memref<4x288xbf16, #tpu.memory_space<vmem>>, vector<4x32xbf16>,
    %92 = vector.extract_strided_slice %88 {offsets = [8, 0], sizes = [4, 32], strides = [1, 1]} : vector<72x32xf32> to vector<4x32xf32>
    %93 = arith.truncf %92 : vector<4x32xf32> to vector<4x32xbf16>
    %c0_54 = arith.constant 0 : index
    %c32_55 = arith.constant 32 : index
    %94 = vector.load %arg23[%c0_54, %c32_55] : memref<4x288xbf16, #tpu.memory_space<vmem>>, vector<4x32xbf16>
    tpu.vector_store %arg23[%c0_54, %c32_55], %93 {strides = array<i32>} : memref<4x288xbf16, #tpu.memory_space<vmem>>, vector<4x32xbf16>,
    %95 = vector.extract_strided_slice %88 {offsets = [16, 0], sizes = [4, 32], strides = [1, 1]} : vector<72x32xf32> to vector<4x32xf32>
    %96 = arith.truncf %95 : vector<4x32xf32> to vector<4x32xbf16>
    %c0_56 = arith.constant 0 : index
    %c64_57 = arith.constant 64 : index
    %97 = vector.load %arg23[%c0_56, %c64_57] : memref<4x288xbf16, #tpu.memory_space<vmem>>, vector<4x32xbf16>
    tpu.vector_store %arg23[%c0_56, %c64_57], %96 {strides = array<i32>} : memref<4x288xbf16, #tpu.memory_space<vmem>>, vector<4x32xbf16>,
    %98 = vector.extract_strided_slice %88 {offsets = [24, 0], sizes = [4, 32], strides = [1, 1]} : vector<72x32xf32> to vector<4x32xf32>
    %99 = arith.truncf %98 : vector<4x32xf32> to vector<4x32xbf16>
    %c0_58 = arith.constant 0 : index
    %c96_59 = arith.constant 96 : index
    %100 = vector.load %arg23[%c0_58, %c96_59] : memref<4x288xbf16, #tpu.memory_space<vmem>>, vector<4x32xbf16>
    tpu.vector_store %arg23[%c0_58, %c96_59], %99 {strides = array<i32>} : memref<4x288xbf16, #tpu.memory_space<vmem>>, vector<4x32xbf16>,
    %101 = vector.extract_strided_slice %88 {offsets = [32, 0], sizes = [4, 32], strides = [1, 1]} : vector<72x32xf32> to vector<4x32xf32>
    %102 = arith.truncf %101 : vector<4x32xf32> to vector<4x32xbf16>
    %c0_60 = arith.constant 0 : index
    %c128_61 = arith.constant 128 : index
    %103 = vector.load %arg23[%c0_60, %c128_61] : memref<4x288xbf16, #tpu.memory_space<vmem>>, vector<4x32xbf16>
    tpu.vector_store %arg23[%c0_60, %c128_61], %102 {strides = array<i32>} : memref<4x288xbf16, #tpu.memory_space<vmem>>, vector<4x32xbf16>,
    %104 = vector.extract_strided_slice %88 {offsets = [40, 0], sizes = [4, 32], strides = [1, 1]} : vector<72x32xf32> to vector<4x32xf32>
    %105 = arith.truncf %104 : vector<4x32xf32> to vector<4x32xbf16>
    %c0_62 = arith.constant 0 : index
    %c160 = arith.constant 160 : index
    %106 = vector.load %arg23[%c0_62, %c160] : memref<4x288xbf16, #tpu.memory_space<vmem>>, vector<4x32xbf16>
    tpu.vector_store %arg23[%c0_62, %c160], %105 {strides = array<i32>} : memref<4x288xbf16, #tpu.memory_space<vmem>>, vector<4x32xbf16>,
    %107 = vector.extract_strided_slice %88 {offsets = [48, 0], sizes = [4, 32], strides = [1, 1]} : vector<72x32xf32> to vector<4x32xf32>
    %108 = arith.truncf %107 : vector<4x32xf32> to vector<4x32xbf16>
    %c0_63 = arith.constant 0 : index
    %c192 = arith.constant 192 : index
    %109 = vector.load %arg23[%c0_63, %c192] : memref<4x288xbf16, #tpu.memory_space<vmem>>, vector<4x32xbf16>
    tpu.vector_store %arg23[%c0_63, %c192], %108 {strides = array<i32>} : memref<4x288xbf16, #tpu.memory_space<vmem>>, vector<4x32xbf16>,
    %110 = vector.extract_strided_slice %88 {offsets = [56, 0], sizes = [4, 32], strides = [1, 1]} : vector<72x32xf32> to vector<4x32xf32>
    %111 = arith.truncf %110 : vector<4x32xf32> to vector<4x32xbf16>
    %c0_64 = arith.constant 0 : index
    %c224 = arith.constant 224 : index
    %112 = vector.load %arg23[%c0_64, %c224] : memref<4x288xbf16, #tpu.memory_space<vmem>>, vector<4x32xbf16>
    tpu.vector_store %arg23[%c0_64, %c224], %111 {strides = array<i32>} : memref<4x288xbf16, #tpu.memory_space<vmem>>, vector<4x32xbf16>,
    %113 = vector.extract_strided_slice %88 {offsets = [64, 0], sizes = [4, 32], strides = [1, 1]} : vector<72x32xf32> to vector<4x32xf32>
    %114 = arith.truncf %113 : vector<4x32xf32> to vector<4x32xbf16>
    %c0_65 = arith.constant 0 : index
    %c256 = arith.constant 256 : index
    %115 = vector.load %arg23[%c0_65, %c256] : memref<4x288xbf16, #tpu.memory_space<vmem>>, vector<4x32xbf16>
    tpu.vector_store %arg23[%c0_65, %c256], %114 {strides = array<i32>} : memref<4x288xbf16, #tpu.memory_space<vmem>>, vector<4x32xbf16>,
    %c0_66 = arith.constant 0 : index
    %c0_67 = arith.constant 0 : index
    %116 = vector.load %arg23[%c0_66, %c0_67] : memref<4x288xbf16, #tpu.memory_space<vmem>>, vector<4x288xbf16>
    %c0_68 = arith.constant 0 : index
    %c0_69 = arith.constant 0 : index
    %117 = vector.load %arg11[%c0_68, %c0_69] : memref<288x64xbf16, #tpu.memory_space<vmem>>, vector<288x64xbf16>
    %cst_70 = arith.constant dense<0.000000e+00> : vector<4x64xf32>
    %118 = tpu.matmul %116, %117, %cst_70 {dimension_numbers = #tpu.dot_dimension_numbers<[1], [0], [0], [1], [0, 0, 1, 1], [], []>} : vector<4x288xbf16>, vector<288x64xbf16>, vector<4x64xf32> -> vector<4x64xf32>
    %c0_71 = arith.constant 0 : index
    %c0_72 = arith.constant 0 : index
    %119 = vector.load %arg12[%c0_71, %c0_72] : memref<1x64xf32, #tpu.memory_space<vmem>>, vector<1x64xf32>
    %120 = vector.broadcast %119 : vector<1x64xf32> to vector<4x64xf32>
    %121 = arith.addf %118, %120 : vector<4x64xf32>
    %cst_73 = arith.constant 2.000000e-01 : f32
    %122 = vector.broadcast %cst_73 : f32 to vector<4x64xf32>
    %123 = arith.mulf %122, %121 : vector<4x64xf32>
    %124 = arith.maximumf %121, %123 : vector<4x64xf32>
    %c0_74 = arith.constant 0 : index
    %c0_75 = arith.constant 0 : index
    %125 = vector.load %arg13[%c0_74, %c0_75] : memref<1x64xf32, #tpu.memory_space<vmem>>, vector<1x64xf32>
    %126 = vector.broadcast %125 : vector<1x64xf32> to vector<4x64xf32>
    %127 = arith.addf %124, %126 : vector<4x64xf32>
    %c0_76 = arith.constant 0 : index
    %c0_77 = arith.constant 0 : index
    %128 = vector.load %arg14[%c0_76, %c0_77] : memref<72x4xbf16, #tpu.memory_space<vmem>>, vector<72x4xbf16>
    %129 = arith.truncf %127 : vector<4x64xf32> to vector<4x64xbf16>
    %cst_78 = arith.constant dense<0.000000e+00> : vector<72x64xf32>
    %130 = tpu.matmul %128, %129, %cst_78 {dimension_numbers = #tpu.dot_dimension_numbers<[1], [0], [0], [1], [0, 0, 1, 1], [], []>} : vector<72x4xbf16>, vector<4x64xbf16>, vector<72x64xf32> -> vector<72x64xf32>
    %131 = vector.extract_strided_slice %130 {offsets = [0, 0], sizes = [1, 64], strides = [1, 1]} : vector<72x64xf32> to vector<1x64xf32>
    %132 = arith.truncf %131 : vector<1x64xf32> to vector<1x64xbf16>
    %c0_79 = arith.constant 0 : index
    %c0_80 = arith.constant 0 : index
    %133 = vector.load %arg24[%c0_79, %c0_80] : memref<1x576xbf16, #tpu.memory_space<vmem>>, vector<1x64xbf16>
    tpu.vector_store %arg24[%c0_79, %c0_80], %132 {strides = array<i32>} : memref<1x576xbf16, #tpu.memory_space<vmem>>, vector<1x64xbf16>,
    %134 = vector.extract_strided_slice %130 {offsets = [8, 0], sizes = [1, 64], strides = [1, 1]} : vector<72x64xf32> to vector<1x64xf32>
    %135 = arith.truncf %134 : vector<1x64xf32> to vector<1x64xbf16>
    %c0_81 = arith.constant 0 : index
    %c64_82 = arith.constant 64 : index
    %136 = vector.load %arg24[%c0_81, %c64_82] : memref<1x576xbf16, #tpu.memory_space<vmem>>, vector<1x64xbf16>
    tpu.vector_store %arg24[%c0_81, %c64_82], %135 {strides = array<i32>} : memref<1x576xbf16, #tpu.memory_space<vmem>>, vector<1x64xbf16>,
    %137 = vector.extract_strided_slice %130 {offsets = [16, 0], sizes = [1, 64], strides = [1, 1]} : vector<72x64xf32> to vector<1x64xf32>
    %138 = arith.truncf %137 : vector<1x64xf32> to vector<1x64xbf16>
    %c0_83 = arith.constant 0 : index
    %c128_84 = arith.constant 128 : index
    %139 = vector.load %arg24[%c0_83, %c128_84] : memref<1x576xbf16, #tpu.memory_space<vmem>>, vector<1x64xbf16>
    tpu.vector_store %arg24[%c0_83, %c128_84], %138 {strides = array<i32>} : memref<1x576xbf16, #tpu.memory_space<vmem>>, vector<1x64xbf16>,
    %140 = vector.extract_strided_slice %130 {offsets = [24, 0], sizes = [1, 64], strides = [1, 1]} : vector<72x64xf32> to vector<1x64xf32>
    %141 = arith.truncf %140 : vector<1x64xf32> to vector<1x64xbf16>
    %c0_85 = arith.constant 0 : index
    %c192_86 = arith.constant 192 : index
    %142 = vector.load %arg24[%c0_85, %c192_86] : memref<1x576xbf16, #tpu.memory_space<vmem>>, vector<1x64xbf16>
    tpu.vector_store %arg24[%c0_85, %c192_86], %141 {strides = array<i32>} : memref<1x576xbf16, #tpu.memory_space<vmem>>, vector<1x64xbf16>,
    %143 = vector.extract_strided_slice %130 {offsets = [32, 0], sizes = [1, 64], strides = [1, 1]} : vector<72x64xf32> to vector<1x64xf32>
    %144 = arith.truncf %143 : vector<1x64xf32> to vector<1x64xbf16>
    %c0_87 = arith.constant 0 : index
    %c256_88 = arith.constant 256 : index
    %145 = vector.load %arg24[%c0_87, %c256_88] : memref<1x576xbf16, #tpu.memory_space<vmem>>, vector<1x64xbf16>
    tpu.vector_store %arg24[%c0_87, %c256_88], %144 {strides = array<i32>} : memref<1x576xbf16, #tpu.memory_space<vmem>>, vector<1x64xbf16>,
    %146 = vector.extract_strided_slice %130 {offsets = [40, 0], sizes = [1, 64], strides = [1, 1]} : vector<72x64xf32> to vector<1x64xf32>
    %147 = arith.truncf %146 : vector<1x64xf32> to vector<1x64xbf16>
    %c0_89 = arith.constant 0 : index
    %c320 = arith.constant 320 : index
    %148 = vector.load %arg24[%c0_89, %c320] : memref<1x576xbf16, #tpu.memory_space<vmem>>, vector<1x64xbf16>
    tpu.vector_store %arg24[%c0_89, %c320], %147 {strides = array<i32>} : memref<1x576xbf16, #tpu.memory_space<vmem>>, vector<1x64xbf16>,
    %149 = vector.extract_strided_slice %130 {offsets = [48, 0], sizes = [1, 64], strides = [1, 1]} : vector<72x64xf32> to vector<1x64xf32>
    %150 = arith.truncf %149 : vector<1x64xf32> to vector<1x64xbf16>
    %c0_90 = arith.constant 0 : index
    %c384 = arith.constant 384 : index
    %151 = vector.load %arg24[%c0_90, %c384] : memref<1x576xbf16, #tpu.memory_space<vmem>>, vector<1x64xbf16>
    tpu.vector_store %arg24[%c0_90, %c384], %150 {strides = array<i32>} : memref<1x576xbf16, #tpu.memory_space<vmem>>, vector<1x64xbf16>,
    %152 = vector.extract_strided_slice %130 {offsets = [56, 0], sizes = [1, 64], strides = [1, 1]} : vector<72x64xf32> to vector<1x64xf32>
    %153 = arith.truncf %152 : vector<1x64xf32> to vector<1x64xbf16>
    %c0_91 = arith.constant 0 : index
    %c448 = arith.constant 448 : index
    %154 = vector.load %arg24[%c0_91, %c448] : memref<1x576xbf16, #tpu.memory_space<vmem>>, vector<1x64xbf16>
    tpu.vector_store %arg24[%c0_91, %c448], %153 {strides = array<i32>} : memref<1x576xbf16, #tpu.memory_space<vmem>>, vector<1x64xbf16>,
    %155 = vector.extract_strided_slice %130 {offsets = [64, 0], sizes = [1, 64], strides = [1, 1]} : vector<72x64xf32> to vector<1x64xf32>
    %156 = arith.truncf %155 : vector<1x64xf32> to vector<1x64xbf16>
    %c0_92 = arith.constant 0 : index
    %c512 = arith.constant 512 : index
    %157 = vector.load %arg24[%c0_92, %c512] : memref<1x576xbf16, #tpu.memory_space<vmem>>, vector<1x64xbf16>
    tpu.vector_store %arg24[%c0_92, %c512], %156 {strides = array<i32>} : memref<1x576xbf16, #tpu.memory_space<vmem>>, vector<1x64xbf16>,
    %c0_93 = arith.constant 0 : index
    %c0_94 = arith.constant 0 : index
    %158 = vector.load %arg24[%c0_93, %c0_94] : memref<1x576xbf16, #tpu.memory_space<vmem>>, vector<1x576xbf16>
    %c0_95 = arith.constant 0 : index
    %c0_96 = arith.constant 0 : index
    %159 = vector.load %arg15[%c0_95, %c0_96] : memref<576x128xbf16, #tpu.memory_space<vmem>>, vector<576x128xbf16>
    %cst_97 = arith.constant dense<0.000000e+00> : vector<1x128xf32>
    %160 = tpu.matmul %158, %159, %cst_97 {dimension_numbers = #tpu.dot_dimension_numbers<[1], [0], [0], [1], [0, 0, 1, 1], [], []>} : vector<1x576xbf16>, vector<576x128xbf16>, vector<1x128xf32> -> vector<1x128xf32>
    %c0_98 = arith.constant 0 : index
    %c0_99 = arith.constant 0 : index
    %161 = vector.load %arg16[%c0_98, %c0_99] : memref<1x128xf32, #tpu.memory_space<vmem>>, vector<1x128xf32>
    %162 = arith.addf %160, %161 : vector<1x128xf32>
    %cst_100 = arith.constant 2.000000e-01 : f32
    %163 = vector.broadcast %cst_100 : f32 to vector<1x128xf32>
    %164 = arith.mulf %163, %162 : vector<1x128xf32>
    %165 = arith.maximumf %162, %164 : vector<1x128xf32>
    %c0_101 = arith.constant 0 : index
    %c0_102 = arith.constant 0 : index
    %166 = vector.load %arg17[%c0_101, %c0_102] : memref<1x128xf32, #tpu.memory_space<vmem>>, vector<1x128xf32>
    %167 = arith.addf %165, %166 : vector<1x128xf32>
    %c0_103 = arith.constant 0 : index
    %c0_104 = arith.constant 0 : index
    %168 = vector.load %arg18[%c0_103, %c0_104] : memref<1x128xf32, #tpu.memory_space<vmem>>, vector<1x128xf32>
    %169 = arith.mulf %167, %168 : vector<1x128xf32>
    %cst_105 = arith.constant dense<0.000000e+00> : vector<1xf32>
    %170 = vector.multi_reduction <add>, %169, %cst_105 [1] : vector<1x128xf32> to vector<1xf32>
    %171 = vector.shape_cast %170 : vector<1xf32> to vector<1x1xf32>
    %cst_106 = arith.constant dense<0.000000e+00> : vector<1xf32>
    %172 = vector.multi_reduction <add>, %171, %cst_106 [0] : vector<1x1xf32> to vector<1xf32>
    %173 = vector.shape_cast %172 : vector<1xf32> to vector<1x1xf32>
    %c0_107 = arith.constant 0 : index
    %c0_108 = arith.constant 0 : index
    %174 = vector.load %arg19[%c0_107, %c0_108] : memref<1x1xf32, #tpu.memory_space<vmem>>, vector<1x1xf32>
    %175 = arith.addf %173, %174 : vector<1x1xf32>
    %cst_109 = arith.constant 5.000000e-01 : f32
    %176 = vector.broadcast %cst_109 : f32 to vector<1x1xf32>
    %177 = arith.mulf %176, %175 : vector<1x1xf32>
    %178 = math.tanh %177 : vector<1x1xf32>
    %cst_110 = arith.constant 1.000000e+00 : f32
    %179 = vector.broadcast %cst_110 : f32 to vector<1x1xf32>
    %180 = arith.addf %178, %179 : vector<1x1xf32>
    %cst_111 = arith.constant 5.000000e-01 : f32
    %181 = vector.broadcast %cst_111 : f32 to vector<1x1xf32>
    %182 = arith.mulf %181, %180 : vector<1x1xf32>
    %c0_112 = arith.constant 0 : index
    %c0_113 = arith.constant 0 : index
    %c0_114 = arith.constant 0 : index
    %183 = vector.load %arg20[%c0_112, %c0_113, %c0_114] : memref<1x1x1xf32, #tpu.memory_space<vmem>>, vector<1x1x1xf32>
    %184 = vector.shape_cast %183 : vector<1x1x1xf32> to vector<1x1xf32>
    %185 = vector.shape_cast %182 : vector<1x1xf32> to vector<1x1x1xf32>
    tpu.vector_store %arg20[%c0_112, %c0_113, %c0_114], %185 {strides = array<i32>} : memref<1x1x1xf32, #tpu.memory_space<vmem>>, vector<1x1x1xf32>,
    return
  }
  func.func @transform_0(%arg0: i32) -> (i32, i32, i32) {
    %c0_i32 = arith.constant 0 : i32
    %c0_i32_0 = arith.constant 0 : i32
    %c0_i32_1 = arith.constant 0 : i32
    return %arg0, %c0_i32, %c0_i32_0 : i32, i32, i32
  }
  func.func @transform_1(%arg0: i32) -> (i32, i32) {
    %c0_i32 = arith.constant 0 : i32
    %c0_i32_0 = arith.constant 0 : i32
    %c0_i32_1 = arith.constant 0 : i32
    return %c0_i32, %c0_i32_0 : i32, i32
  }
  func.func @transform_2(%arg0: i32) -> (i32, i32) {
    %c0_i32 = arith.constant 0 : i32
    %c0_i32_0 = arith.constant 0 : i32
    %c0_i32_1 = arith.constant 0 : i32
    return %c0_i32, %c0_i32_0 : i32, i32
  }
  func.func @transform_3(%arg0: i32) -> (i32, i32) {
    %c0_i32 = arith.constant 0 : i32
    %c0_i32_0 = arith.constant 0 : i32
    %c0_i32_1 = arith.constant 0 : i32
    return %c0_i32, %c0_i32_0 : i32, i32
  }
  func.func @transform_4(%arg0: i32) -> (i32, i32) {
    %c0_i32 = arith.constant 0 : i32
    %c0_i32_0 = arith.constant 0 : i32
    %c0_i32_1 = arith.constant 0 : i32
    return %c0_i32, %c0_i32_0 : i32, i32
  }
  func.func @transform_5(%arg0: i32) -> (i32, i32) {
    %c0_i32 = arith.constant 0 : i32
    %c0_i32_0 = arith.constant 0 : i32
    %c0_i32_1 = arith.constant 0 : i32
    return %c0_i32, %c0_i32_0 : i32, i32
  }
  func.func @transform_6(%arg0: i32) -> (i32, i32) {
    %c0_i32 = arith.constant 0 : i32
    %c0_i32_0 = arith.constant 0 : i32
    %c0_i32_1 = arith.constant 0 : i32
    return %c0_i32, %c0_i32_0 : i32, i32
  }
  func.func @transform_7(%arg0: i32) -> (i32, i32) {
    %c0_i32 = arith.constant 0 : i32
    %c0_i32_0 = arith.constant 0 : i32
    %c0_i32_1 = arith.constant 0 : i32
    return %c0_i32, %c0_i32_0 : i32, i32
  }
  func.func @transform_8(%arg0: i32) -> (i32, i32) {
    %c0_i32 = arith.constant 0 : i32
    %c0_i32_0 = arith.constant 0 : i32
    %c0_i32_1 = arith.constant 0 : i32
    return %c0_i32, %c0_i32_0 : i32, i32
  }
  func.func @transform_9(%arg0: i32) -> (i32, i32) {
    %c0_i32 = arith.constant 0 : i32
    %c0_i32_0 = arith.constant 0 : i32
    %c0_i32_1 = arith.constant 0 : i32
    return %c0_i32, %c0_i32_0 : i32, i32
  }
  func.func @transform_10(%arg0: i32) -> (i32, i32) {
    %c0_i32 = arith.constant 0 : i32
    %c0_i32_0 = arith.constant 0 : i32
    %c0_i32_1 = arith.constant 0 : i32
    return %c0_i32, %c0_i32_0 : i32, i32
  }
  func.func @transform_11(%arg0: i32) -> (i32, i32) {
    %c0_i32 = arith.constant 0 : i32
    %c0_i32_0 = arith.constant 0 : i32
    %c0_i32_1 = arith.constant 0 : i32
    return %c0_i32, %c0_i32_0 : i32, i32
  }
  func.func @transform_12(%arg0: i32) -> (i32, i32) {
    %c0_i32 = arith.constant 0 : i32
    %c0_i32_0 = arith.constant 0 : i32
    %c0_i32_1 = arith.constant 0 : i32
    return %c0_i32, %c0_i32_0 : i32, i32
  }
  func.func @transform_13(%arg0: i32) -> (i32, i32) {
    %c0_i32 = arith.constant 0 : i32
    %c0_i32_0 = arith.constant 0 : i32
    %c0_i32_1 = arith.constant 0 : i32
    return %c0_i32, %c0_i32_0 : i32, i32
  }
  func.func @transform_14(%arg0: i32) -> (i32, i32) {
    %c0_i32 = arith.constant 0 : i32
    %c0_i32_0 = arith.constant 0 : i32
    %c0_i32_1 = arith.constant 0 : i32
    return %c0_i32, %c0_i32_0 : i32, i32
  }
  func.func @transform_15(%arg0: i32) -> (i32, i32) {
    %c0_i32 = arith.constant 0 : i32
    %c0_i32_0 = arith.constant 0 : i32
    %c0_i32_1 = arith.constant 0 : i32
    return %c0_i32, %c0_i32_0 : i32, i32
  }
  func.func @transform_16(%arg0: i32) -> (i32, i32) {
    %c0_i32 = arith.constant 0 : i32
    %c0_i32_0 = arith.constant 0 : i32
    %c0_i32_1 = arith.constant 0 : i32
    return %c0_i32, %c0_i32_0 : i32, i32
  }
  func.func @transform_17(%arg0: i32) -> (i32, i32) {
    %c0_i32 = arith.constant 0 : i32
    %c0_i32_0 = arith.constant 0 : i32
    %c0_i32_1 = arith.constant 0 : i32
    return %c0_i32, %c0_i32_0 : i32, i32
  }
  func.func @transform_18(%arg0: i32) -> (i32, i32) {
    %c0_i32 = arith.constant 0 : i32
    %c0_i32_0 = arith.constant 0 : i32
    %c0_i32_1 = arith.constant 0 : i32
    return %c0_i32, %c0_i32_0 : i32, i32
  }
  func.func @transform_19(%arg0: i32) -> (i32, i32, i32) {
    %c0_i32 = arith.constant 0 : i32
    %c0_i32_0 = arith.constant 0 : i32
    %c0_i32_1 = arith.constant 0 : i32
    return %arg0, %c0_i32, %c0_i32_0 : i32, i32, i32
  }
}

</mosaic_0001>

<bundles_post_ra>
// kernel: discriminator_forward.1
= control target key start
LH: loop header
LB: loop body
LE: loop exit
PB: predicated region body
PF: predicated region fallthrough
CT: control target
= control target key end

     0   :  { %s4776_s20 = smov 0   ;;  %s5685_s0 = inlined_call_operand.vmem [shape: f32[2,256,4], index: 0, kind: input, shape index: {}]   ;;  %s5686_s1 = inlined_call_operand.vmem [shape: bf16[576,256], index: 1, kind: input, shape index: {}]   ;;  %s5687_s2 = inlined_call_operand.vmem [shape: bf16[36,16], index: 2, kind: input, shape index: {}]   ;;  %s5688_s3 = inlined_call_operand.vmem [shape: f32[1,16], index: 3, kind: input, shape index: {}]   ;;  %s5689_s4 = inlined_call_operand.vmem [shape: f32[1,16], index: 4, kind: input, shape index: {}]   ;;  %s5690_s5 = inlined_call_operand.vmem [shape: bf16[144,64], index: 5, kind: input, shape index: {}]   ;;  %s5691_s6 = inlined_call_operand.vmem [shape: bf16[144,32], index: 6, kind: input, shape index: {}]   ;;  %s5692_s7 = inlined_call_operand.vmem [shape: f32[1,32], index: 7, kind: input, shape index: {}]   ;;  %s5693_s8 = inlined_call_operand.vmem [shape: f32[1,32], index: 8, kind: input, shape index: {}]   ;;  %s5694_s9 = inlined_call_operand.vmem [shape: bf16[72,16], index: 9, kind: input, shape index: {}]   ;;  %s5695_s10 = inlined_call_operand.vmem [shape: bf16[288,64], index: 10, kind: input, shape index: {}]   ;;  %s5696_s11 = inlined_call_operand.vmem [shape: f32[1,64], index: 11, kind: input, shape index: {}]   ;;  %s5697_s12 = inlined_call_operand.vmem [shape: f32[1,64], index: 12, kind: input, shape index: {}]   ;;  %s5698_s13 = inlined_call_operand.vmem [shape: bf16[72,4], index: 13, kind: input, shape index: {}]   ;;  %s5699_s14 = inlined_call_operand.vmem [shape: bf16[576,128], index: 14, kind: input, shape index: {}]   ;;  %s5700_s15 = inlined_call_operand.vmem [shape: f32[1,128], index: 15, kind: input, shape index: {}]   ;;  %s5701_s16 = inlined_call_operand.vmem [shape: f32[1,128], index: 16, kind: input, shape index: {}]   ;;  %s5702_s17 = inlined_call_operand.vmem [shape: f32[1,128], index: 17, kind: input, shape index: {}]   ;;  %s5703_s18 = inlined_call_operand.<no memory space> [shape: f32[1,1], index: 18, kind: input, shape index: {}]   ;;  %s5704_s19 = inlined_call_operand.vmem [shape: f32[2,1,1], index: 19, kind: output, shape index: {}]  }
   0x1   :  { %5707 = sst [smem:[#allocation7_spill]] %s5685_s0  ;;  %v24_v0 = vstv %s5703_s18 }
   0x2   :  { %5708 = sst [smem:[#allocation8_spill]] %s5686_s1  ;;  %25 = vst [vmem:[#allocation6] sm:$0x1] %v24_v0 }
   0x3   :  { %5709 = sst [smem:[#allocation9_spill]] %s5687_s2 }
   0x4   :  { %5710 = sst [smem:[#allocation10_spill]] %s5688_s3 }
   0x5 LB: > { %s3775_s21 = sadd.s32 4294967295, %s4653_s20   ;;  %p3779_p0 = scmp.ge.s32.totalorder %s4653_s20, 1  ;;  %s4653_s20 = sphi %s4776_s20, %s31_s20  }
   0x6   : > { %p539_p1 = scmp.lt.s32.totalorder %s4653_s20, 3 }
   0x8   : > { %p540_p2 = pnand %p3779_p0, %p539_p1 }
   0x9   : > { %p593_p3 = scmp.lt.s32.totalorder (!%p540_p2), %s3775_s21, 1  ;;  %s5711_s22 = sld [smem:[#allocation8_spill]] (!%p540_p2) }
   0xa   : > { %543 = sbr.rel (%p540_p2) target bundleno = 2827 (0xb0b), region = 96  ;;  %s5712_s25 = sld [smem:[#allocation7_spill]] (!%p540_p2) }
   0xb   : > { %s4656_s28 = smov (!%p540_p2), 4   ;;  %s4657_s1 = smov (!%p540_p2), 8  }
   0xc   : > { %s4659_s24 = smov (!%p540_p2), 16   ;;  %s4662_s26 = smov (!%p540_p2), 28  }
   0xd   : > { %s5713_s0 = sld [smem:[#allocation9_spill]] (!%p540_p2)  ;;  %s4667_s29 = smov (!%p540_p2), 64  }
   0xf   : > { %v4655_v1 = vmov 0   ;;  %v4449_v2 = vld [vmem:[%s5711_s22 + $0x4] ss:$8 sps:$4 sm:$0xff]   ;;  %s5720_s21 = smov (!%p593_p3, %s3775_s21), 1  ;;  %v4447_v51 = vld [vmem:[%s5711_s22] ss:$8 sps:$4 sm:$0xff]  }
  0x10   : > { %1082 = vmatprep.subr.bf16.mxu0 %v4655_v1  ;;  %4388 = vmatprep.subr.bf16.mxu1 %v4655_v1  ;;  %s4069_s2 = sshll.u32 %s5720_s21, 8  ;;  %v4450_v52 = vld [vmem:[%s5711_s22 + $0x14] ss:$8 sps:$4 sm:$0xff]   ;;  %v4452_v53 = vld [vmem:[%s5711_s22 + $0x10] ss:$8 sps:$4 sm:$0xff]   ;;  %vm1435_vm0 = vcmask 27648  }
  0x11   : > { %1114 = vmatprep.mubr.bf16.mxu0 %v4449_v2  ;;  %s4795_s3 = scalar_lea.vmem %s5712_s25, %s4069_s2  ;;  %v4453_v54 = vld [vmem:[%s5711_s22 + $0x24] ss:$8 sps:$4 sm:$0xff]   ;;  %v4455_v55 = vld [vmem:[%s5711_s22 + $0x20] ss:$8 sps:$4 sm:$0xff]   ;;  %v4456_v56 = vld [vmem:[%s5711_s22 + $0x34] ss:$8 sps:$4 sm:$0xff]  }
  0x12   : > { %v616_v3 = vld [vmem:[%s4795_s3 + $0x70] sm:$0xff]  ;;  %v617_v4 = vld [vmem:[%s4795_s3 + $0x78] sm:$0xff]  ;;  %v614_v5 = vld [vmem:[%s4795_s3 + $0x60] sm:$0xff]  ;;  %vm1492_vm1 = vcmask 60448   ;;  %s4660_s25 = smov 20   ;;  %vm1549_vm2 = vcmask 93248  }
  0x13   : > { %v713_v6 = vpack.c.bf16 %v617_v4, %v616_v3  ;;  %v615_v7 = vld [vmem:[%s4795_s3 + $0x68] sm:$0xff]  ;;  %v612_v9 = vld [vmem:[%s4795_s3 + $0x50] sm:$0xff]  ;;  %v613_v10 = vld [vmem:[%s4795_s3 + $0x58] sm:$0xff]  ;;  %vm1606_vm3 = vcmask 126048   ;;  %vm1663_vm4 = vcmask 158848   ;;  %vm1968_vm5 = vcmask 1041408  }
  0x14   : > { %v712_v8 = vpack.c.bf16 %v615_v7, %v614_v5  ;;  %v711_v11 = vpack.c.bf16 %v613_v10, %v612_v9  ;;  %v610_v12 = vld [vmem:[%s4795_s3 + $0x40] sm:$0xff]  ;;  %v611_v13 = vld [vmem:[%s4795_s3 + $0x48] sm:$0xff]  ;;  %v608_v15 = vld [vmem:[%s4795_s3 + $0x30] sm:$0xff]  ;;  %vm1720_vm6 = vcmask 191648   ;;  %vm1777_vm7 = vcmask 224448   ;;  %s4668_s2 = smov 80  }
  0x15   : > { %1083 = vmatpush1.bf16.msra.mxu0 %v713_v6  ;;  %4404 = vmatpush1.bf16.msra.mxu1 %v713_v6  ;;  %v710_v14 = vpack.c.bf16 %v611_v13, %v610_v12  ;;  %v609_v16 = vld [vmem:[%s4795_s3 + $0x38] sm:$0xff]  ;;  %v606_v18 = vld [vmem:[%s4795_s3 + $0x20] sm:$0xff]  ;;  %v607_v19 = vld [vmem:[%s4795_s3 + $0x28] sm:$0xff]  ;;  %vm1834_vm8 = vcmask 257248   ;;  %vm1891_vm9 = vcmask 290048   ;;  %vm1955_vm10 = vcmask 293888  }
  0x16   : > { %1084 = vmatprep.subr.bf16.mxu0 %v4655_v1  ;;  %4389 = vmatprep.subr.bf16.mxu1 %v4655_v1  ;;  %v709_v17 = vpack.c.bf16 %v609_v16, %v608_v15  ;;  %v708_v20 = vpack.c.bf16 %v607_v19, %v606_v18  ;;  %v604_v21 = vld [vmem:[%s4795_s3 + $0x10] sm:$0xff]  ;;  %v605_v22 = vld [vmem:[%s4795_s3 + $0x18] sm:$0xff]  ;;  %v602_v23 = vld [vmem:[%s4795_s3] sm:$0xff]  ;;  %vm4665_vm11 = vmmov 0   ;;  %vm2135_vm12 = vcmask 523264  }
  0x17   : > { %v603_v24 = vld [vmem:[%s4795_s3 + $0x8] sm:$0xff]  ;;  %v707_v25 = vpack.c.bf16 %v605_v22, %v604_v21  ;;  %v632_v26 = vld [vmem:[%s4795_s3 + $0xf0] sm:$0xff]  ;;  %v633_v28 = vld [vmem:[%s4795_s3 + $0xf8] sm:$0xff]  ;;  %vm2276_vm13 = vcmask 125952   ;;  %vm2291_vm14 = vcmask 257152   ;;  %vm2306_vm15 = vcmask 388352  }
  0x18   : > { %v706_v27 = vpack.c.bf16 %v603_v24, %v602_v23  ;;  %v630_v29 = vld [vmem:[%s4795_s3 + $0xe0] sm:$0xff]  ;;  %v631_v30 = vld [vmem:[%s4795_s3 + $0xe8] sm:$0xff]  ;;  %v721_v31 = vpack.c.bf16 %v633_v28, %v632_v26  ;;  %v628_v32 = vld [vmem:[%s4795_s3 + $0xd0] sm:$0xff] }
  0x19   : > { %1085 = vmatpush1.bf16.msra.mxu0 %v712_v8  ;;  %4405 = vmatpush1.bf16.msra.mxu1 %v712_v8  ;;  %v720_v33 = vpack.c.bf16 %v631_v30, %v630_v29  ;;  %v629_v34 = vld [vmem:[%s4795_s3 + $0xd8] sm:$0xff]  ;;  %v626_v35 = vld [vmem:[%s4795_s3 + $0xc0] sm:$0xff]  ;;  %v627_v36 = vld [vmem:[%s4795_s3 + $0xc8] sm:$0xff] }
  0x1a   : > { %1086 = vmatprep.subr.bf16.mxu0 %v4655_v1  ;;  %4390 = vmatprep.subr.bf16.mxu1 %v4655_v1  ;;  %v719_v37 = vpack.c.bf16 %v629_v34, %v628_v32  ;;  %v624_v38 = vld [vmem:[%s4795_s3 + $0xb0] sm:$0xff]  ;;  %v718_v39 = vpack.c.bf16 %v627_v36, %v626_v35  ;;  %v625_v40 = vld [vmem:[%s4795_s3 + $0xb8] sm:$0xff]  ;;  %v622_v41 = vld [vmem:[%s4795_s3 + $0xa0] sm:$0xff] }
  0x1b   : > { %v623_v42 = vld [vmem:[%s4795_s3 + $0xa8] sm:$0xff]  ;;  %v717_v43 = vpack.c.bf16 %v625_v40, %v624_v38  ;;  %v620_v44 = vld [vmem:[%s4795_s3 + $0x90] sm:$0xff]  ;;  %v621_v46 = vld [vmem:[%s4795_s3 + $0x98] sm:$0xff] }
  0x1c   : > { %v716_v45 = vpack.c.bf16 %v623_v42, %v622_v41  ;;  %v618_v47 = vld [vmem:[%s4795_s3 + $0x80] sm:$0xff]  ;;  %v619_v48 = vld [vmem:[%s4795_s3 + $0x88] sm:$0xff]  ;;  %v715_v49 = vpack.c.bf16 %v621_v46, %v620_v44  ;;  %v4458_v57 = vld [vmem:[%s5711_s22 + $0x30] ss:$8 sps:$4 sm:$0xff]   ;;  %s4661_s3 = smov 24  }
  0x1d   : > { %1087 = vmatpush1.bf16.msra.mxu0 %v711_v11  ;;  %4406 = vmatpush1.bf16.msra.mxu1 %v711_v11  ;;  %v714_v50 = vpack.c.bf16 %v619_v48, %v618_v47  ;;  %v4459_v58 = vld [vmem:[%s5711_s22 + $0x44] ss:$8 sps:$4 sm:$0xff]   ;;  %v4461_v59 = vld [vmem:[%s5711_s22 + $0x40] ss:$8 sps:$4 sm:$0xff]   ;;  %v4462_v60 = vld [vmem:[%s5711_s22 + $0x54] ss:$8 sps:$4 sm:$0xff]  }
  0x1e   : > { %1088 = vmatprep.subr.bf16.mxu0 %v4655_v1  ;;  %4391 = vmatprep.subr.bf16.mxu1 %v4655_v1  ;;  %v4464_v61 = vld [vmem:[%s5711_s22 + $0x50] ss:$8 sps:$4 sm:$0xff]   ;;  %v4465_v62 = vld [vmem:[%s5711_s22 + $0x64] ss:$8 sps:$4 sm:$0xff]   ;;  %v4467_v63 = vld [vmem:[%s5711_s22 + $0x60] ss:$8 sps:$4 sm:$0xff]  }
  0x1f   : > { %v4468_v0 = vld [vmem:[%s5711_s22 + $0x74] ss:$8 sps:$4 sm:$0xff]   ;;  %v4470_v2 = vld [vmem:[%s5711_s22 + $0x70] ss:$8 sps:$4 sm:$0xff]   ;;  %v4471_v3 = vld [vmem:[%s5711_s22 + $0x84] ss:$8 sps:$4 sm:$0xff]  }
  0x20   : > { %v4473_v4 = vld [vmem:[%s5711_s22 + $0x80] ss:$8 sps:$4 sm:$0xff]   ;;  %v4474_v5 = vld [vmem:[%s5711_s22 + $0x94] ss:$8 sps:$4 sm:$0xff]   ;;  %v4476_v6 = vld [vmem:[%s5711_s22 + $0x90] ss:$8 sps:$4 sm:$0xff]  }
  0x21   : > { %1089 = vmatpush1.bf16.msra.mxu0 %v710_v14  ;;  %4407 = vmatpush1.bf16.msra.mxu1 %v710_v14  ;;  %v4477_v7 = vld [vmem:[%s5711_s22 + $0xa4] ss:$8 sps:$4 sm:$0xff]   ;;  %v4479_v8 = vld [vmem:[%s5711_s22 + $0xa0] ss:$8 sps:$4 sm:$0xff]   ;;  %v4480_v9 = vld [vmem:[%s5711_s22 + $0xb4] ss:$8 sps:$4 sm:$0xff]  }
  0x22   : > { %1090 = vmatprep.subr.bf16.mxu0 %v4655_v1  ;;  %4392 = vmatprep.subr.bf16.mxu1 %v4655_v1  ;;  %v4482_v10 = vld [vmem:[%s5711_s22 + $0xb0] ss:$8 sps:$4 sm:$0xff]   ;;  %v4483_v11 = vld [vmem:[%s5711_s22 + $0xc4] ss:$8 sps:$4 sm:$0xff]   ;;  %v4485_v12 = vld [vmem:[%s5711_s22 + $0xc0] ss:$8 sps:$4 sm:$0xff]  }
  0x23   : > { %v4486_v13 = vld [vmem:[%s5711_s22 + $0xd4] ss:$8 sps:$4 sm:$0xff]   ;;  %v4488_v14 = vld [vmem:[%s5711_s22 + $0xd0] ss:$8 sps:$4 sm:$0xff]   ;;  %v4489_v15 = vld [vmem:[%s5711_s22 + $0xe4] ss:$8 sps:$4 sm:$0xff]  }
  0x24   : > { %v4491_v16 = vld [vmem:[%s5711_s22 + $0xe0] ss:$8 sps:$4 sm:$0xff]   ;;  %v4494_v18 = vld [vmem:[%s5711_s22 + $0xf0] ss:$8 sps:$4 sm:$0xff]   ;;  %v4495_v19 = vld [vmem:[%s5711_s22 + $0x104] ss:$8 sps:$4 sm:$0xff]  }
  0x25   : > { %1091 = vmatpush1.bf16.msra.mxu0 %v709_v17  ;;  %4408 = vmatpush1.bf16.msra.mxu1 %v709_v17  ;;  %v4492_v17 = vld [vmem:[%s5711_s22 + $0xf4] ss:$8 sps:$4 sm:$0xff]   ;;  %v4544_v22 = vld [vmem:[%s5711_s22 + $0x224] ss:$8 sps:$4 sm:$0xff]   ;;  %v4542_v23 = vld [vmem:[%s5711_s22 + $0x220] ss:$8 sps:$4 sm:$0xff]  }
  0x26   : > { %1092 = vmatprep.subr.bf16.mxu0 %v4655_v1  ;;  %4393 = vmatprep.subr.bf16.mxu1 %v4655_v1  ;;  %v4498_v21 = vld [vmem:[%s5711_s22 + $0x114] ss:$8 sps:$4 sm:$0xff]   ;;  %v4500_v24 = vld [vmem:[%s5711_s22 + $0x110] ss:$8 sps:$4 sm:$0xff]   ;;  %v4503_v28 = vld [vmem:[%s5711_s22 + $0x120] ss:$8 sps:$4 sm:$0xff]  }
  0x27   : > { %1386 = vmatprep.mubr.bf16.mxu1 %v4544_v22  ;;  %v4548_v26 = vld [vmem:[%s5711_s22 + $0x234] ss:$8 sps:$4 sm:$0xff]   ;;  %v4506_v30 = vld [vmem:[%s5711_s22 + $0x130] ss:$8 sps:$4 sm:$0xff]   ;;  %v4509_v32 = vld [vmem:[%s5711_s22 + $0x140] ss:$8 sps:$4 sm:$0xff]  }
  0x28   : > { %v4504_v29 = vld [vmem:[%s5711_s22 + $0x134] ss:$8 sps:$4 sm:$0xff]   ;;  %v4512_v34 = vld [vmem:[%s5711_s22 + $0x150] ss:$8 sps:$4 sm:$0xff]   ;;  %v4513_v35 = vld [vmem:[%s5711_s22 + $0x164] ss:$8 sps:$4 sm:$0xff]  }
  0x29   : > { %1093 = vmatpush1.bf16.msra.mxu0 %v708_v20  ;;  %4409 = vmatpush1.bf16.msra.mxu1 %v708_v20  ;;  %v4497_v20 = vld [vmem:[%s5711_s22 + $0x100] ss:$8 sps:$4 sm:$0xff]   ;;  %v4518_v38 = vld [vmem:[%s5711_s22 + $0x170] ss:$8 sps:$4 sm:$0xff]  }
  0x2a   : > { %1094 = vmatprep.subr.bf16.mxu0 %v4655_v1  ;;  %4394 = vmatprep.subr.bf16.mxu1 %v4655_v1  ;;  %v4515_v36 = vld [vmem:[%s5711_s22 + $0x160] ss:$8 sps:$4 sm:$0xff]   ;;  %v684_v46 = vld [vmem:[%s5711_s22 + $0x190] sm:$0xff]  ;;  %v685_v47 = vld [vmem:[%s5711_s22 + $0x198] sm:$0xff] }
  0x2b   : > { %v682_v40 = vld [vmem:[%s5711_s22 + $0x180] sm:$0xff]  ;;  %v683_v41 = vld [vmem:[%s5711_s22 + $0x188] sm:$0xff] }
  0x2c   : > { %v3830_v42 = vcombine.low %v682_v40, %v683_v41  ;;  %v4541_v41 = vld [vmem:[%s5711_s22 + $0x204] ss:$8 sps:$4 sm:$0xff]  }
  0x2d   : > { %1095 = vmatpush1.bf16.msra.mxu0 %v707_v25  ;;  %4410 = vmatpush1.bf16.msra.mxu1 %v707_v25  ;;  %v4501_v25 = vld [vmem:[%s5711_s22 + $0x124] ss:$8 sps:$4 sm:$0xff]  }
  0x2e   : > { %1096 = vmatprep.subr.bf16.mxu0 %v4655_v1  ;;  %4395 = vmatprep.subr.bf16.mxu1 %v4655_v1 }
  0x31   : > { %1097 = vmatpush1.bf16.msra.mxu0 %v706_v27  ;;  %4411 = vmatpush1.bf16.msra.mxu1 %v706_v27  ;;  %v4550_v27 = vld [vmem:[%s5711_s22 + $0x230] ss:$8 sps:$4 sm:$0xff]  }
  0x32   : > { %1098 = vmatprep.subr.bf16.mxu0 %v4655_v1  ;;  %4396 = vmatprep.subr.bf16.mxu1 %v4655_v1 }
  0x35   : > { %1099 = vmatpush2.bf16.msra.mxu0 %v721_v31  ;;  %4412 = vmatpush2.bf16.msra.mxu1 %v721_v31  ;;  %v4507_v31 = vld [vmem:[%s5711_s22 + $0x144] ss:$8 sps:$4 sm:$0xff]  }
  0x36   : > { %1100 = vmatprep.subr.bf16.mxu0 %v4655_v1  ;;  %4397 = vmatprep.subr.bf16.mxu1 %v4655_v1 }
  0x39   : > { %1101 = vmatpush2.bf16.msra.mxu0 %v720_v33  ;;  %4413 = vmatpush2.bf16.msra.mxu1 %v720_v33  ;;  %v4510_v33 = vld [vmem:[%s5711_s22 + $0x154] ss:$8 sps:$4 sm:$0xff]  }
  0x3a   : > { %1102 = vmatprep.subr.bf16.mxu0 %v4655_v1  ;;  %4398 = vmatprep.subr.bf16.mxu1 %v4655_v1 }
  0x3d   : > { %1103 = vmatpush2.bf16.msra.mxu0 %v719_v37  ;;  %4414 = vmatpush2.bf16.msra.mxu1 %v719_v37  ;;  %v4516_v37 = vld [vmem:[%s5711_s22 + $0x174] ss:$8 sps:$4 sm:$0xff]  }
  0x3e   : > { %1104 = vmatprep.subr.bf16.mxu0 %v4655_v1  ;;  %4399 = vmatprep.subr.bf16.mxu1 %v4655_v1 }
  0x41   : > { %1105 = vmatpush2.bf16.msra.mxu0 %v718_v39  ;;  %4415 = vmatpush2.bf16.msra.mxu1 %v718_v39  ;;  %v4519_v39 = vld [vmem:[%s5711_s22 + $0x184] ss:$8 sps:$4 sm:$0xff]  }
  0x42   : > { %1106 = vmatprep.subr.bf16.mxu0 %v4655_v1  ;;  %4400 = vmatprep.subr.bf16.mxu1 %v4655_v1 }
  0x45   : > { %1107 = vmatpush2.bf16.msra.mxu0 %v717_v43  ;;  %4416 = vmatpush2.bf16.msra.mxu1 %v717_v43  ;;  %v4521_v43 = vld [vmem:[%s5711_s22 + $0x194] ss:$8 sps:$4 sm:$0xff]  }
  0x46   : > { %1108 = vmatprep.subr.bf16.mxu0 %v4655_v1  ;;  %4401 = vmatprep.subr.bf16.mxu1 %v4655_v1 }
  0x49   : > { %1109 = vmatpush2.bf16.msra.mxu0 %v716_v45  ;;  %4417 = vmatpush2.bf16.msra.mxu1 %v716_v45 }
  0x4a   : > { %1110 = vmatprep.subr.bf16.mxu0 %v4655_v1  ;;  %4402 = vmatprep.subr.bf16.mxu1 %v4655_v1 }
  0x4d   : > { %1111 = vmatpush2.bf16.msra.mxu0 %v715_v49  ;;  %4418 = vmatpush2.bf16.msra.mxu1 %v715_v49 }
  0x4e   : > { %1112 = vmatprep.subr.bf16.mxu0 %v4655_v1  ;;  %4403 = vmatprep.subr.bf16.mxu1 %v4655_v1 }
  0x51   : > { %1113 = vmatpush2.bf16.msra.mxu0 %v714_v50  ;;  %4419 = vmatpush2.bf16.msra.mxu1 %v714_v50  ;;  %v3832_v50 = vcombine.low %v684_v46, %v685_v47  ;;  %v4539_v47 = vld [vmem:[%s5711_s22 + $0x200] ss:$8 sps:$4 sm:$0xff]  }
  0x54   : > { %1115 = vmatmul.mubr.bf16.vlgmr.msra.gmra.mxu0 %v4447_v51  ;;  %1387 = vmatmul.mubr.bf16.vlgmr.msra.gmra.mxu1 %v4542_v23  ;;  %v4530_v23 = vld [vmem:[%s5711_s22 + $0x1d0] ss:$8 sps:$4 sm:$0xff]  }
  0x55   : > { %1122 = vmatprep.mubr.bf16.mxu0 %v4450_v52  ;;  %1394 = vmatprep.mubr.bf16.mxu1 %v4548_v26  ;;  %v4523_v52 = vld [vmem:[%s5711_s22 + $0x1a4] ss:$8 sps:$4 sm:$0xff]  }
  0x5c   : > { %1123 = vmatmul.mubr.bf16.gmra.mxu0 %v4452_v53  ;;  %1395 = vmatmul.mubr.bf16.gmra.mxu1 %v4550_v27 }
  0x5d   : > { %1130 = vmatprep.mubr.bf16.mxu0 %v4453_v54 }
  0x64   : > { %1131 = vmatmul.mubr.bf16.gmra.mxu0 %v4455_v55 }
  0x65   : > { %1138 = vmatprep.mubr.bf16.mxu0 %v4456_v56  ;;  %v686_v56 = vld [vmem:[%s5711_s22 + $0x1a0] sm:$0xff] }
  0x6c   : > { %1139 = vmatmul.mubr.bf16.gmra.mxu0 %v4458_v57  ;;  %v687_v57 = vld [vmem:[%s5711_s22 + $0x1a8] sm:$0xff] }
  0x6d   : > { %1146 = vmatprep.mubr.bf16.mxu0 %v4459_v58 }
  0x74   : > { %1147 = vmatmul.mubr.bf16.gmra.mxu0 %v4461_v59 }
  0x75   : > { %1154 = vmatprep.mubr.bf16.mxu0 %v4462_v60  ;;  %v3834_v60 = vcombine.low %v686_v56, %v687_v57 }
  0x7c   : > { %1155 = vmatmul.mubr.bf16.gmra.mxu0 %v4464_v61 }
  0x7d   : > { %1162 = vmatprep.mubr.bf16.mxu0 %v4465_v62  ;;  %v4525_v62 = vld [vmem:[%s5711_s22 + $0x1b4] ss:$8 sps:$4 sm:$0xff]  }
  0x84   : > { %1163 = vmatmul.mubr.bf16.gmra.mxu0 %v4467_v63 }
  0x85   : > { %1170 = vmatprep.mubr.bf16.mxu0 %v4468_v0 }
  0x8c   : > { %1171 = vmatmul.mubr.bf16.gmra.mxu0 %v4470_v2 }
  0x8d   : > { %1178 = vmatprep.mubr.bf16.mxu0 %v4471_v3  ;;  %v688_v3 = vld [vmem:[%s5711_s22 + $0x1b0] sm:$0xff] }
  0x94   : > { %1179 = vmatmul.mubr.bf16.gmra.mxu0 %v4473_v4  ;;  %v689_v4 = vld [vmem:[%s5711_s22 + $0x1b8] sm:$0xff] }
  0x95   : > { %1186 = vmatprep.mubr.bf16.mxu0 %v4474_v5 }
  0x9c   : > { %1187 = vmatmul.mubr.bf16.gmra.mxu0 %v4476_v6 }
  0x9d   : > { %1194 = vmatprep.mubr.bf16.mxu0 %v4477_v7  ;;  %v3836_v7 = vcombine.low %v688_v3, %v689_v4 }
  0xa4   : > { %1195 = vmatmul.mubr.bf16.gmra.mxu0 %v4479_v8 }
  0xa5   : > { %1202 = vmatprep.mubr.bf16.mxu0 %v4480_v9  ;;  %v4529_v9 = vld [vmem:[%s5711_s22 + $0x1c4] ss:$8 sps:$4 sm:$0xff]  }
  0xac   : > { %1203 = vmatmul.mubr.bf16.gmra.mxu0 %v4482_v10 }
  0xad   : > { %1210 = vmatprep.mubr.bf16.mxu0 %v4483_v11 }
  0xb4   : > { %1211 = vmatmul.mubr.bf16.gmra.mxu0 %v4485_v12 }
  0xb5   : > { %1218 = vmatprep.mubr.bf16.mxu0 %v4486_v13 }
  0xbc   : > { %1219 = vmatmul.mubr.bf16.gmra.mxu0 %v4488_v14 }
  0xbd   : > { %1226 = vmatprep.mubr.bf16.mxu0 %v4489_v15  ;;  %v4527_v15 = vld [vmem:[%s5711_s22 + $0x1c0] ss:$8 sps:$4 sm:$0xff]  }
  0xc4   : > { %1227 = vmatmul.mubr.bf16.gmra.mxu0 %v4491_v16 }
  0xc5   : > { %1234 = vmatprep.mubr.bf16.mxu0 %v4492_v17  ;;  %v4532_v17 = vld [vmem:[%s5711_s22 + $0x1d4] ss:$8 sps:$4 sm:$0xff]  }
  0xcc   : > { %1235 = vmatmul.mubr.bf16.gmra.mxu0 %v4494_v18 }
  0xcd   : > { %1242 = vmatprep.mubr.bf16.mxu0 %v4495_v19 }
  0xd4   : > { %1243 = vmatmul.mubr.bf16.gmra.mxu0 %v4497_v20 }
  0xd5   : > { %1250 = vmatprep.mubr.bf16.mxu0 %v4498_v21 }
  0xdc   : > { %1251 = vmatmul.mubr.bf16.gmra.mxu0 %v4500_v24 }
  0xdd   : > { %1258 = vmatprep.mubr.bf16.mxu0 %v4501_v25  ;;  %v4535_v25 = vld [vmem:[%s5711_s22 + $0x1e4] ss:$8 sps:$4 sm:$0xff]  }
  0xe4   : > { %1259 = vmatmul.mubr.bf16.gmra.mxu0 %v4503_v28 }
  0xe5   : > { %1266 = vmatprep.mubr.bf16.mxu0 %v4504_v29 }
  0xec   : > { %1267 = vmatmul.mubr.bf16.gmra.mxu0 %v4506_v30 }
  0xed   : > { %1274 = vmatprep.mubr.bf16.mxu0 %v4507_v31  ;;  %v4533_v31 = vld [vmem:[%s5711_s22 + $0x1e0] ss:$8 sps:$4 sm:$0xff]  }
  0xf4   : > { %1275 = vmatmul.mubr.bf16.gmra.mxu0 %v4509_v32 }
  0xf5   : > { %1282 = vmatprep.mubr.bf16.mxu0 %v4510_v33  ;;  %v4538_v33 = vld [vmem:[%s5711_s22 + $0x1f4] ss:$8 sps:$4 sm:$0xff]  }
  0xfc   : > { %1283 = vmatmul.mubr.bf16.gmra.mxu0 %v4512_v34 }
  0xfd   : > { %1290 = vmatprep.mubr.bf16.mxu0 %v4513_v35 }
 0x104   : > { %1291 = vmatmul.mubr.bf16.gmra.mxu0 %v4515_v36 }
 0x105   : > { %1298 = vmatprep.mubr.bf16.mxu0 %v4516_v37 }
 0x10c   : > { %1299 = vmatmul.mubr.bf16.gmra.mxu0 %v4518_v38 }
 0x10d   : > { %1306 = vmatprep.mubr.bf16.mxu0 %v4519_v39  ;;  %v4536_v39 = vld [vmem:[%s5711_s22 + $0x1f0] ss:$8 sps:$4 sm:$0xff]  }
 0x114   : > { %v1116_v44 = vpop.f32.mrf.mxu0  ;;  %1307 = vmatmul.mubr.bf16.gmra.mxu0 %v3830_v42 }
 0x115   : > { %v4070_v45 = vpack.c.bf16 %v1116_v44, %v1116_v44  ;;  %1314 = vmatprep.mubr.bf16.mxu0 %v4521_v43 }
 0x116   : > { %v1118_v48 = vpop.f32.mrf.mxu0 }
 0x117   : > { %1436 = vst.msk [vmem:[#allocation2] sm:$0xf] %vm1435_vm0, %v4070_v45 }
 0x118   : > { %v1119_v49 = vpop.f32.mrf.mxu0 }
 0x119   : > { %v4071_v51 = vpack.c.bf16 %v1119_v49, %v1119_v49  ;;  %v4547_v49 = vld [vmem:[%s5711_s22 + $0x214] ss:$8 sps:$4 sm:$0xff]  }
 0x11a   : > { %v1121_v53 = vpop.f32.mrf.mxu0 }
 0x11b   : > { %1437 = vst.msk [vmem:[#allocation2 + $0x4] sm:$0xf] %vm1435_vm0, %v4071_v51 }
 0x11c   : > { %v1124_v54 = vpop.f32.mrf.mxu0  ;;  %1315 = vmatmul.mubr.bf16.gmra.mxu0 %v3832_v50 }
 0x11d   : > { %v4072_v55 = vpack.c.bf16 %v1124_v54, %v1124_v54  ;;  %1322 = vmatprep.mubr.bf16.mxu0 %v4523_v52 }
 0x11e   : > { %v1126_v58 = vpop.f32.mrf.mxu0 }
 0x11f   : > { %1438 = vst.msk [vmem:[#allocation2 + $0x8] sm:$0xf] %vm1435_vm0, %v4072_v55  ;;  %v4545_v55 = vld [vmem:[%s5711_s22 + $0x210] ss:$8 sps:$4 sm:$0xff]  }
 0x120   : > { %v1127_v59 = vpop.f32.mrf.mxu0 }
 0x121   : > { %v4073_v61 = vpack.c.bf16 %v1127_v59, %v1127_v59 }
 0x122   : > { %v1129_v63 = vpop.f32.mrf.mxu0 }
 0x123   : > { %1439 = vst.msk [vmem:[#allocation2 + $0xc] sm:$0xf] %vm1435_vm0, %v4073_v61 }
 0x124   : > { %v1132_v0 = vpop.f32.mrf.mxu0  ;;  %1323 = vmatmul.mubr.bf16.gmra.mxu0 %v3834_v60 }
 0x125   : > { %v4074_v2 = vpack.c.bf16 %v1132_v0, %v1132_v0  ;;  %1330 = vmatprep.mubr.bf16.mxu0 %v4525_v62 }
 0x126   : > { %v1134_v5 = vpop.f32.mrf.mxu0 }
 0x127   : > { %1440 = vst.msk [vmem:[#allocation2 + $0x10] sm:$0xf] %vm1435_vm0, %v4074_v2 }
 0x128   : > { %v1135_v6 = vpop.f32.mrf.mxu0 }
 0x129   : > { %v4075_v8 = vpack.c.bf16 %v1135_v6, %v1135_v6 }
 0x12a   : > { %v1137_v10 = vpop.f32.mrf.mxu0 }
 0x12b   : > { %1441 = vst.msk [vmem:[#allocation2 + $0x14] sm:$0xf] %vm1435_vm0, %v4075_v8 }
 0x12c   : > { %v1140_v11 = vpop.f32.mrf.mxu0  ;;  %1331 = vmatmul.mubr.bf16.gmra.mxu0 %v3836_v7 }
 0x12d   : > { %v4076_v12 = vpack.c.bf16 %v1140_v11, %v1140_v11  ;;  %1338 = vmatprep.mubr.bf16.mxu0 %v4529_v9 }
 0x12e   : > { %v1142_v13 = vpop.f32.mrf.mxu0 }
 0x12f   : > { %1442 = vst.msk [vmem:[#allocation2 + $0x18] sm:$0xf] %vm1435_vm0, %v4076_v12 }
 0x130   : > { %v1143_v14 = vpop.f32.mrf.mxu0 }
 0x131   : > { %v4077_v16 = vpack.c.bf16 %v1143_v14, %v1143_v14 }
 0x132   : > { %v1145_v18 = vpop.f32.mrf.mxu0 }
 0x133   : > { %1443 = vst.msk [vmem:[#allocation2 + $0x1c] sm:$0xf] %vm1435_vm0, %v4077_v16  ;;  %vm2321_vm0 = vcmask 519552  }
 0x134   : > { %v1148_v19 = vpop.f32.mrf.mxu0  ;;  %1339 = vmatmul.mubr.bf16.gmra.mxu0 %v4527_v15 }
 0x135   : > { %v4078_v20 = vpack.c.bf16 %v1148_v19, %v1148_v19  ;;  %1346 = vmatprep.mubr.bf16.mxu0 %v4532_v17 }
 0x136   : > { %v1150_v21 = vpop.f32.mrf.mxu0 }
 0x137   : > { %1468 = vrot.lane.b32.xlu0 %v4078_v20, %s4656_s28 }
 0x138   : > { %v1151_v22 = vpop.f32.mrf.mxu0 }
 0x139   : > { %v4079_v24 = vpack.c.bf16 %v1151_v22, %v1151_v22 }
 0x13a   : > { %v1153_v26 = vpop.f32.mrf.mxu0 }
 0x13b   : > { %1470 = vrot.lane.b32.xlu0 %v4079_v24, %s4656_s28 }
 0x13c   : > { %v1156_v27 = vpop.f32.mrf.mxu0  ;;  %1347 = vmatmul.mubr.bf16.gmra.mxu0 %v4530_v23 }
 0x13d   : > { %v4080_v28 = vpack.c.bf16 %v1156_v27, %v1156_v27  ;;  %1354 = vmatprep.mubr.bf16.mxu0 %v4535_v25 }
 0x13e   : > { %v1158_v29 = vpop.f32.mrf.mxu0 }
 0x13f   : > { %1472 = vrot.lane.b32.xlu1 %v4080_v28, %s4656_s28 }
 0x140   : > { %v1159_v30 = vpop.f32.mrf.mxu0 }
 0x141   : > { %v4081_v32 = vpack.c.bf16 %v1159_v30, %v1159_v30 }
 0x142   : > { %v1161_v34 = vpop.f32.mrf.mxu0 }
 0x143   : > { %1474 = vrot.lane.b32.xlu1 %v4081_v32, %s4656_s28 }
 0x144   : > { %v1164_v35 = vpop.f32.mrf.mxu0  ;;  %1355 = vmatmul.mubr.bf16.gmra.mxu0 %v4533_v31 }
 0x145   : > { %v4082_v36 = vpack.c.bf16 %v1164_v35, %v1164_v35  ;;  %1362 = vmatprep.mubr.bf16.mxu0 %v4538_v33 }
 0x146   : > { %v1166_v37 = vpop.f32.mrf.mxu0 }
 0x147   : > { %1476 = vrot.lane.b32.xlu0 %v4082_v36, %s4656_s28 }
 0x148   : > { %v1167_v38 = vpop.f32.mrf.mxu0 }
 0x149   : > { %v4083_v40 = vpack.c.bf16 %v1167_v38, %v1167_v38 }
 0x14a   : > { %v1169_v42 = vpop.f32.mrf.mxu0 }
 0x14b   : > { %1478 = vrot.lane.b32.xlu1 %v4083_v40, %s4656_s28  ;;  %v5108_v40 = vpop.f32.mrf.mxu1 }
 0x14c   : > { %v1172_v43 = vpop.f32.mrf.mxu0  ;;  %1363 = vmatmul.mubr.bf16.gmra.mxu0 %v4536_v39 }
 0x14d   : > { %v4084_v44 = vpack.c.bf16 %v1172_v43, %v1172_v43  ;;  %1370 = vmatprep.mubr.bf16.mxu0 %v4541_v41  ;;  %v1390_v42 = vpop.f32.mrf.mxu1 }
 0x14e   : > { %v1174_v45 = vpop.f32.mrf.mxu0 }
 0x14f   : > { %1480 = vrot.lane.b32.xlu0 %v4084_v44, %s4656_s28  ;;  %v5111_v45 = vpop.f32.mrf.mxu1 }
 0x150   : > { %v1175_v46 = vpop.f32.mrf.mxu0 }
 0x151   : > { %v4085_v48 = vpack.c.bf16 %v1175_v46, %v1175_v46 }
 0x152   : > { %v1177_v50 = vpop.f32.mrf.mxu0 }
 0x153   : > { %1482 = vrot.lane.b32.xlu1 %v4085_v48, %s4656_s28  ;;  %s4658_s28 = smov 12  }
 0x154   : > { %v1180_v51 = vpop.f32.mrf.mxu0  ;;  %1371 = vmatmul.mubr.bf16.gmra.mxu0 %v4539_v47  ;;  %v1393_v47 = vpop.f32.mrf.mxu1 }
 0x155   : > { %v4086_v52 = vpack.c.bf16 %v1180_v51, %v1180_v51  ;;  %1378 = vmatprep.mubr.bf16.mxu0 %v4547_v49 }
 0x156   : > { %v1182_v53 = vpop.f32.mrf.mxu0  ;;  %v5114_v50 = vpop.f32.mrf.mxu1 }
 0x157   : > { %1525 = vrot.lane.b32.xlu0 %v4086_v52, %s4657_s1 }
 0x158   : > { %v1183_v54 = vpop.f32.mrf.mxu0  ;;  %v1398_v52 = vpop.f32.mrf.mxu1 }
 0x159   : > { %v4087_v56 = vpack.c.bf16 %v1183_v54, %v1183_v54 }
 0x15a   : > { %v1185_v57 = vpop.f32.mrf.mxu0 }
 0x15b   : > { %1527 = vrot.lane.b32.xlu1 %v4087_v56, %s4657_s1 }
 0x15c   : > { %v1188_v58 = vpop.f32.mrf.mxu0  ;;  %1379 = vmatmul.mubr.bf16.gmra.mxu0 %v4545_v55  ;;  %v5117_v55 = vpop.f32.mrf.mxu1 }
 0x15d   : > { %v4088_v59 = vpack.c.bf16 %v1188_v58, %v1188_v58 }
 0x15e   : > { %v1190_v60 = vpop.f32.mrf.mxu0  ;;  %v1401_v57 = vpop.f32.mrf.mxu1 }
 0x15f   : > { %1529 = vrot.lane.b32.xlu0 %v4088_v59, %s4657_s1 }
 0x160   : > { %v1191_v61 = vpop.f32.mrf.mxu0 }
 0x161   : > { %v4089_v62 = vpack.c.bf16 %v1191_v61, %v1191_v61 }
 0x162   : > { %v1193_v63 = vpop.f32.mrf.mxu0 }
 0x163   : > { %1531 = vrot.lane.b32.xlu1 %v4089_v62, %s4657_s1 }
 0x164   : > { %v1196_v0 = vpop.f32.mrf.mxu0 }
 0x165   : > { %v4090_v2 = vpack.c.bf16 %v1196_v0, %v1196_v0 }
 0x166   : > { %v1198_v3 = vpop.f32.mrf.mxu0 }
 0x167   : > { %1533 = vrot.lane.b32.xlu0 %v4090_v2, %s4657_s1 }
 0x168   : > { %v1199_v4 = vpop.f32.mrf.mxu0 }
 0x169   : > { %v4091_v5 = vpack.c.bf16 %v1199_v4, %v1199_v4 }
 0x16a   : > { %v1201_v6 = vpop.f32.mrf.mxu0 }
 0x16b   : > { %1535 = vrot.lane.b32.xlu1 %v4091_v5, %s4657_s1 }
 0x16c   : > { %v1204_v7 = vpop.f32.mrf.mxu0 }
 0x16d   : > { %v4092_v8 = vpack.c.bf16 %v1204_v7, %v1204_v7 }
 0x16e   : > { %v1206_v9 = vpop.f32.mrf.mxu0 }
 0x16f   : > { %1537 = vrot.lane.b32.xlu0 %v4092_v8, %s4657_s1 }
 0x170   : > { %v1207_v10 = vpop.f32.mrf.mxu0 }
 0x171   : > { %v4093_v11 = vpack.c.bf16 %v1207_v10, %v1207_v10 }
 0x172   : > { %v1209_v12 = vpop.f32.mrf.mxu0 }
 0x173   : > { %1539 = vrot.lane.b32.xlu1 %v4093_v11, %s4657_s1  ;;  %s4663_s1 = smov 32  }
 0x174   : > { %v1212_v13 = vpop.f32.mrf.mxu0 }
 0x175   : > { %v4094_v14 = vpack.c.bf16 %v1212_v13, %v1212_v13 }
 0x176   : > { %v1214_v15 = vpop.f32.mrf.mxu0 }
 0x177   : > { %1582 = vrot.lane.b32.xlu0 %v4094_v14, %s4658_s28 }
 0x178   : > { %v1215_v16 = vpop.f32.mrf.mxu0 }
 0x179   : > { %v4095_v17 = vpack.c.bf16 %v1215_v16, %v1215_v16 }
 0x17a   : > { %v1217_v18 = vpop.f32.mrf.mxu0 }
 0x17b   : > { %1584 = vrot.lane.b32.xlu1 %v4095_v17, %s4658_s28 }
 0x17c   : > { %v1220_v19 = vpop.f32.mrf.mxu0 }
 0x17d   : > { %v4096_v20 = vpack.c.bf16 %v1220_v19, %v1220_v19 }
 0x17e   : > { %v1222_v21 = vpop.f32.mrf.mxu0 }
 0x17f   : > { %1586 = vrot.lane.b32.xlu0 %v4096_v20, %s4658_s28 }
 0x180   : > { %v1223_v22 = vpop.f32.mrf.mxu0 }
 0x181   : > { %v4097_v23 = vpack.c.bf16 %v1223_v22, %v1223_v22 }
 0x182   : > { %v1225_v24 = vpop.f32.mrf.mxu0 }
 0x183   : > { %1588 = vrot.lane.b32.xlu1 %v4097_v23, %s4658_s28 }
 0x184   : > { %v1228_v25 = vpop.f32.mrf.mxu0 }
 0x185   : > { %v4098_v26 = vpack.c.bf16 %v1228_v25, %v1228_v25 }
 0x186   : > { %v1230_v27 = vpop.f32.mrf.mxu0 }
 0x187   : > { %1590 = vrot.lane.b32.xlu0 %v4098_v26, %s4658_s28 }
 0x188   : > { %v1231_v28 = vpop.f32.mrf.mxu0 }
 0x189   : > { %v4099_v29 = vpack.c.bf16 %v1231_v28, %v1231_v28 }
 0x18a   : > { %v1233_v30 = vpop.f32.mrf.mxu0 }
 0x18b   : > { %1592 = vrot.lane.b32.xlu1 %v4099_v29, %s4658_s28 }
 0x18c   : > { %v1236_v31 = vpop.f32.mrf.mxu0 }
 0x18d   : > { %v4100_v32 = vpack.c.bf16 %v1236_v31, %v1236_v31 }
 0x18e   : > { %v1238_v33 = vpop.f32.mrf.mxu0 }
 0x18f   : > { %1594 = vrot.lane.b32.xlu0 %v4100_v32, %s4658_s28 }
 0x190   : > { %v1239_v34 = vpop.f32.mrf.mxu0 }
 0x191   : > { %v4101_v35 = vpack.c.bf16 %v1239_v34, %v1239_v34 }
 0x192   : > { %v1241_v36 = vpop.f32.mrf.mxu0 }
 0x193   : > { %1596 = vrot.lane.b32.xlu1 %v4101_v35, %s4658_s28  ;;  %s600_s28 = scalar_lea.vmem %s5704_s19, %s5720_s21 }
 0x194   : > { %v1244_v37 = vpop.f32.mrf.mxu0 }
 0x195   : > { %v4102_v38 = vpack.c.bf16 %v1244_v37, %v1244_v37 }
 0x196   : > { %v1246_v39 = vpop.f32.mrf.mxu0 }
 0x197   : > { %1639 = vrot.lane.b32.xlu0 %v4102_v38, %s4659_s24 }
 0x198   : > { %v1247_v41 = vpop.f32.mrf.mxu0 }
 0x199   : > { %v4103_v43 = vpack.c.bf16 %v1247_v41, %v1247_v41 }
 0x19a   : > { %v1249_v44 = vpop.f32.mrf.mxu0 }
 0x19b   : > { %1641 = vrot.lane.b32.xlu1 %v4103_v43, %s4659_s24 }
 0x19c   : > { %v1252_v46 = vpop.f32.mrf.mxu0 }
 0x19d   : > { %v4104_v48 = vpack.c.bf16 %v1252_v46, %v1252_v46 }
 0x19e   : > { %v1254_v49 = vpop.f32.mrf.mxu0 }
 0x19f   : > { %1643 = vrot.lane.b32.xlu0 %v4104_v48, %s4659_s24 }
 0x1a0   : > { %v1255_v51 = vpop.f32.mrf.mxu0 }
 0x1a1   : > { %v4105_v53 = vpack.c.bf16 %v1255_v51, %v1255_v51 }
 0x1a2   : > { %v1257_v54 = vpop.f32.mrf.mxu0 }
 0x1a3   : > { %1645 = vrot.lane.b32.xlu1 %v4105_v53, %s4659_s24 }
 0x1a4   : > { %v1260_v56 = vpop.f32.mrf.mxu0 }
 0x1a5   : > { %v4106_v58 = vpack.c.bf16 %v1260_v56, %v1260_v56 }
 0x1a6   : > { %v1262_v59 = vpop.f32.mrf.mxu0 }
 0x1a7   : > { %1647 = vrot.lane.b32.xlu0 %v4106_v58, %s4659_s24 }
 0x1a8   : > { %v1263_v60 = vpop.f32.mrf.mxu0 }
 0x1a9   : > { %v4107_v61 = vpack.c.bf16 %v1263_v60, %v1263_v60  ;;  %v1469_v62 = vpop.permute.xlu0 %1468 }
 0x1aa   : > { %1493 = vst.msk [vmem:[#allocation2] sm:$0xf] %vm1492_vm1, %v1469_v62  ;;  %v1265_v63 = vpop.f32.mrf.mxu0 }
 0x1ab   : > { %1649 = vrot.lane.b32.xlu1 %v4107_v61, %s4659_s24 }
 0x1ac   : > { %v1268_v0 = vpop.f32.mrf.mxu0 }
 0x1ad   : > { %v4108_v2 = vpack.c.bf16 %v1268_v0, %v1268_v0  ;;  %v1471_v3 = vpop.permute.xlu0 %1470 }
 0x1ae   : > { %1494 = vst.msk [vmem:[#allocation2 + $0x4] sm:$0xf] %vm1492_vm1, %v1471_v3  ;;  %v1270_v4 = vpop.f32.mrf.mxu0 }
 0x1af   : > { %1651 = vrot.lane.b32.xlu0 %v4108_v2, %s4659_s24 }
 0x1b0   : > { %v1271_v5 = vpop.f32.mrf.mxu0 }
 0x1b1   : > { %v4109_v6 = vpack.c.bf16 %v1271_v5, %v1271_v5  ;;  %v1473_v7 = vpop.permute.xlu1 %1472 }
 0x1b2   : > { %1495 = vst.msk [vmem:[#allocation2 + $0x8] sm:$0xf] %vm1492_vm1, %v1473_v7  ;;  %v1273_v8 = vpop.f32.mrf.mxu0 }
 0x1b3   : > { %1653 = vrot.lane.b32.xlu1 %v4109_v6, %s4659_s24 }
 0x1b4   : > { %v1276_v9 = vpop.f32.mrf.mxu0 }
 0x1b5   : > { %v4110_v10 = vpack.c.bf16 %v1276_v9, %v1276_v9  ;;  %v1475_v11 = vpop.permute.xlu1 %1474 }
 0x1b6   : > { %1496 = vst.msk [vmem:[#allocation2 + $0xc] sm:$0xf] %vm1492_vm1, %v1475_v11  ;;  %v1278_v12 = vpop.f32.mrf.mxu0 }
 0x1b7   : > { %1696 = vrot.lane.b32.xlu0 %v4110_v10, %s4660_s25 }
 0x1b8   : > { %v1279_v13 = vpop.f32.mrf.mxu0 }
 0x1b9   : > { %v4111_v14 = vpack.c.bf16 %v1279_v13, %v1279_v13  ;;  %v1477_v15 = vpop.permute.xlu0 %1476 }
 0x1ba   : > { %1497 = vst.msk [vmem:[#allocation2 + $0x10] sm:$0xf] %vm1492_vm1, %v1477_v15  ;;  %v1281_v16 = vpop.f32.mrf.mxu0 }
 0x1bb   : > { %1698 = vrot.lane.b32.xlu1 %v4111_v14, %s4660_s25 }
 0x1bc   : > { %v1284_v17 = vpop.f32.mrf.mxu0 }
 0x1bd   : > { %v4112_v18 = vpack.c.bf16 %v1284_v17, %v1284_v17  ;;  %v1479_v19 = vpop.permute.xlu1 %1478 }
 0x1be   : > { %1498 = vst.msk [vmem:[#allocation2 + $0x14] sm:$0xf] %vm1492_vm1, %v1479_v19  ;;  %v1286_v20 = vpop.f32.mrf.mxu0 }
 0x1bf   : > { %1700 = vrot.lane.b32.xlu0 %v4112_v18, %s4660_s25 }
 0x1c0   : > { %v1287_v21 = vpop.f32.mrf.mxu0 }
 0x1c1   : > { %v4113_v22 = vpack.c.bf16 %v1287_v21, %v1287_v21  ;;  %v1481_v23 = vpop.permute.xlu0 %1480 }
 0x1c2   : > { %1499 = vst.msk [vmem:[#allocation2 + $0x18] sm:$0xf] %vm1492_vm1, %v1481_v23  ;;  %v1289_v24 = vpop.f32.mrf.mxu0 }
 0x1c3   : > { %1702 = vrot.lane.b32.xlu1 %v4113_v22, %s4660_s25 }
 0x1c4   : > { %v1292_v25 = vpop.f32.mrf.mxu0 }
 0x1c5   : > { %v4114_v26 = vpack.c.bf16 %v1292_v25, %v1292_v25  ;;  %v1483_v27 = vpop.permute.xlu1 %1482 }
 0x1c6   : > { %1500 = vst.msk [vmem:[#allocation2 + $0x1c] sm:$0xf] %vm1492_vm1, %v1483_v27  ;;  %v1294_v28 = vpop.f32.mrf.mxu0  ;;  %vm2336_vm1 = vcmask 650752  }
 0x1c7   : > { %1704 = vrot.lane.b32.xlu0 %v4114_v26, %s4660_s25 }
 0x1c8   : > { %v1295_v29 = vpop.f32.mrf.mxu0 }
 0x1c9   : > { %v4115_v30 = vpack.c.bf16 %v1295_v29, %v1295_v29  ;;  %v1526_v31 = vpop.permute.xlu0 %1525 }
 0x1ca   : > { %1550 = vst.msk [vmem:[#allocation2] sm:$0xf] %vm1549_vm2, %v1526_v31  ;;  %v1297_v32 = vpop.f32.mrf.mxu0 }
 0x1cb   : > { %1706 = vrot.lane.b32.xlu1 %v4115_v30, %s4660_s25 }
 0x1cc   : > { %v1300_v33 = vpop.f32.mrf.mxu0 }
 0x1cd   : > { %v4116_v34 = vpack.c.bf16 %v1300_v33, %v1300_v33  ;;  %v1528_v35 = vpop.permute.xlu1 %1527 }
 0x1ce   : > { %1551 = vst.msk [vmem:[#allocation2 + $0x4] sm:$0xf] %vm1549_vm2, %v1528_v35  ;;  %v1302_v36 = vpop.f32.mrf.mxu0 }
 0x1cf   : > { %1708 = vrot.lane.b32.xlu0 %v4116_v34, %s4660_s25 }
 0x1d0   : > { %v1303_v37 = vpop.f32.mrf.mxu0 }
 0x1d1   : > { %v4117_v38 = vpack.c.bf16 %v1303_v37, %v1303_v37  ;;  %v1530_v39 = vpop.permute.xlu0 %1529 }
 0x1d2   : > { %1552 = vst.msk [vmem:[#allocation2 + $0x8] sm:$0xf] %vm1549_vm2, %v1530_v39  ;;  %v1305_v41 = vpop.f32.mrf.mxu0 }
 0x1d3   : > { %1710 = vrot.lane.b32.xlu1 %v4117_v38, %s4660_s25 }
 0x1d4   : > { %v1308_v42 = vpop.f32.mrf.mxu0 }
 0x1d5   : > { %v4118_v43 = vpack.c.bf16 %v1308_v42, %v1308_v42  ;;  %v1532_v44 = vpop.permute.xlu1 %1531 }
 0x1d6   : > { %1553 = vst.msk [vmem:[#allocation2 + $0xc] sm:$0xf] %vm1549_vm2, %v1532_v44  ;;  %v1310_v46 = vpop.f32.mrf.mxu0 }
 0x1d7   : > { %1753 = vrot.lane.b32.xlu0 %v4118_v43, %s4661_s3 }
 0x1d8   : > { %v1311_v47 = vpop.f32.mrf.mxu0 }
 0x1d9   : > { %v4119_v48 = vpack.c.bf16 %v1311_v47, %v1311_v47  ;;  %v1534_v49 = vpop.permute.xlu0 %1533  ;;  %v4551_v47 = vld [vmem:[%s5713_s0 + $0x10] ss:$0 sps:$4 sm:$0x33]  }
 0x1da   : > { %1554 = vst.msk [vmem:[#allocation2 + $0x10] sm:$0xf] %vm1549_vm2, %v1534_v49  ;;  %v1313_v51 = vpop.f32.mrf.mxu0  ;;  %4420 = vmatprep.subr.msk.bf16.mxu1 %vm1968_vm5, %v4551_v47  ;;  %v1970_v49 = vsel %vm1968_vm5, %v4551_v47, 0 }
 0x1db   : > { %1755 = vrot.lane.b32.xlu1 %v4119_v48, %s4661_s3  ;;  %4267 = vmatpush3.bf16.msra.mxu1 %v1970_v49 }
 0x1dc   : > { %v1316_v52 = vpop.f32.mrf.mxu0 }
 0x1dd   : > { %v4120_v53 = vpack.c.bf16 %v1316_v52, %v1316_v52  ;;  %v1536_v54 = vpop.permute.xlu1 %1535 }
 0x1de   : > { %1555 = vst.msk [vmem:[#allocation2 + $0x14] sm:$0xf] %vm1549_vm2, %v1536_v54  ;;  %v1318_v56 = vpop.f32.mrf.mxu0  ;;  %v4552_v54 = vld [vmem:[%s5713_s0 + $0x8] sm:$0xff]  }
 0x1df   : > { %1757 = vrot.lane.b32.xlu0 %v4120_v53, %s4661_s3  ;;  %4268 = vmatprep.subr.bf16.mxu1 %v4552_v54 }
 0x1e0   : > { %v1319_v57 = vpop.f32.mrf.mxu0  ;;  %4269 = vmatpush3.bf16.msra.mxu1 %v4552_v54 }
 0x1e1   : > { %v4121_v58 = vpack.c.bf16 %v1319_v57, %v1319_v57  ;;  %v1538_v59 = vpop.permute.xlu0 %1537 }
 0x1e2   : > { %1556 = vst.msk [vmem:[#allocation2 + $0x18] sm:$0xf] %vm1549_vm2, %v1538_v59  ;;  %v1321_v60 = vpop.f32.mrf.mxu0 }
 0x1e3   : > { %1759 = vrot.lane.b32.xlu1 %v4121_v58, %s4661_s3  ;;  %v4554_v60 = vld [vmem:[%s5713_s0] sm:$0xff]  }
 0x1e4   : > { %v1324_v61 = vpop.f32.mrf.mxu0  ;;  %4270 = vmatprep.subr.bf16.mxu1 %v4554_v60 }
 0x1e5   : > { %v4122_v62 = vpack.c.bf16 %v1324_v61, %v1324_v61  ;;  %v1540_v63 = vpop.permute.xlu1 %1539  ;;  %4271 = vmatpush3.bf16.msra.mxu1 %v4554_v60 }
 0x1e6   : > { %1557 = vst.msk [vmem:[#allocation2 + $0x1c] sm:$0xf] %vm1549_vm2, %v1540_v63  ;;  %v1326_v0 = vpop.f32.mrf.mxu0  ;;  %vm2351_vm2 = vcmask 781952  }
 0x1e7   : > { %1761 = vrot.lane.b32.xlu0 %v4122_v62, %s4661_s3 }
 0x1e8   : > { %v1327_v2 = vpop.f32.mrf.mxu0 }
 0x1e9   : > { %v4123_v3 = vpack.c.bf16 %v1327_v2, %v1327_v2  ;;  %v1583_v4 = vpop.permute.xlu0 %1582 }
 0x1ea   : > { %1607 = vst.msk [vmem:[#allocation2] sm:$0xf] %vm1606_vm3, %v1583_v4  ;;  %v1329_v5 = vpop.f32.mrf.mxu0  ;;  %v4138_v4 = vpack.c.bf16 %v5108_v40, %v5108_v40  ;;  %v4141_v40 = vpack.c.bf16 %v5117_v55, %v5117_v55 }
 0x1eb   : > { %1763 = vrot.lane.b32.xlu1 %v4123_v3, %s4661_s3 }
 0x1ec   : > { %v1332_v6 = vpop.f32.mrf.mxu0 }
 0x1ed   : > { %v4124_v7 = vpack.c.bf16 %v1332_v6, %v1332_v6  ;;  %v1585_v8 = vpop.permute.xlu1 %1584 }
 0x1ee   : > { %1608 = vst.msk [vmem:[#allocation2 + $0x4] sm:$0xf] %vm1606_vm3, %v1585_v8  ;;  %v1334_v9 = vpop.f32.mrf.mxu0  ;;  %v4140_v8 = vpack.c.bf16 %v5114_v50, %v5114_v50 }
 0x1ef   : > { %1765 = vrot.lane.b32.xlu0 %v4124_v7, %s4661_s3  ;;  %v4139_v9 = vpack.c.bf16 %v5111_v45, %v5111_v45 }
 0x1f0   : > { %v1335_v10 = vpop.f32.mrf.mxu0 }
 0x1f1   : > { %v4125_v11 = vpack.c.bf16 %v1335_v10, %v1335_v10  ;;  %v1587_v12 = vpop.permute.xlu0 %1586 }
 0x1f2   : > { %1609 = vst.msk [vmem:[#allocation2 + $0x8] sm:$0xf] %vm1606_vm3, %v1587_v12  ;;  %v1337_v13 = vpop.f32.mrf.mxu0 }
 0x1f3   : > { %1767 = vrot.lane.b32.xlu1 %v4125_v11, %s4661_s3  ;;  %s5714_s3 = sld [smem:[#allocation10_spill]] }
 0x1f4   : > { %v1340_v14 = vpop.f32.mrf.mxu0 }
 0x1f5   : > { %v4126_v15 = vpack.c.bf16 %v1340_v14, %v1340_v14  ;;  %v1589_v16 = vpop.permute.xlu1 %1588 }
 0x1f6   : > { %1610 = vst.msk [vmem:[#allocation2 + $0xc] sm:$0xf] %vm1606_vm3, %v1589_v16  ;;  %v1342_v17 = vpop.f32.mrf.mxu0 }
 0x1f7   : > { %1810 = vrot.lane.b32.xlu0 %v4126_v15, %s4662_s26 }
 0x1f8   : > { %v1343_v18 = vpop.f32.mrf.mxu0 }
 0x1f9   : > { %v4127_v19 = vpack.c.bf16 %v1343_v18, %v1343_v18  ;;  %v1591_v20 = vpop.permute.xlu0 %1590 }
 0x1fa   : > { %1611 = vst.msk [vmem:[#allocation2 + $0x10] sm:$0xf] %vm1606_vm3, %v1591_v20  ;;  %v1345_v21 = vpop.f32.mrf.mxu0 }
 0x1fb   : > { %1812 = vrot.lane.b32.xlu1 %v4127_v19, %s4662_s26 }
 0x1fc   : > { %v1348_v22 = vpop.f32.mrf.mxu0 }
 0x1fd   : > { %v4128_v23 = vpack.c.bf16 %v1348_v22, %v1348_v22  ;;  %v1593_v24 = vpop.permute.xlu1 %1592 }
 0x1fe   : > { %1612 = vst.msk [vmem:[#allocation2 + $0x14] sm:$0xf] %vm1606_vm3, %v1593_v24  ;;  %v1350_v25 = vpop.f32.mrf.mxu0 }
 0x1ff   : > { %1814 = vrot.lane.b32.xlu0 %v4128_v23, %s4662_s26 }
 0x200   : > { %v1351_v26 = vpop.f32.mrf.mxu0 }
 0x201   : > { %v4129_v27 = vpack.c.bf16 %v1351_v26, %v1351_v26  ;;  %v1595_v28 = vpop.permute.xlu0 %1594 }
 0x202   : > { %1613 = vst.msk [vmem:[#allocation2 + $0x18] sm:$0xf] %vm1606_vm3, %v1595_v28  ;;  %v1353_v29 = vpop.f32.mrf.mxu0 }
 0x203   : > { %1816 = vrot.lane.b32.xlu1 %v4129_v27, %s4662_s26 }
 0x204   : > { %v1356_v30 = vpop.f32.mrf.mxu0 }
 0x205   : > { %v4130_v31 = vpack.c.bf16 %v1356_v30, %v1356_v30  ;;  %v1597_v32 = vpop.permute.xlu1 %1596 }
 0x206   : > { %1614 = vst.msk [vmem:[#allocation2 + $0x1c] sm:$0xf] %vm1606_vm3, %v1597_v32  ;;  %v1358_v33 = vpop.f32.mrf.mxu0  ;;  %vm2366_vm3 = vcmask 913152  }
 0x207   : > { %1818 = vrot.lane.b32.xlu0 %v4130_v31, %s4662_s26 }
 0x208   : > { %v1359_v34 = vpop.f32.mrf.mxu0 }
 0x209   : > { %v4131_v35 = vpack.c.bf16 %v1359_v34, %v1359_v34  ;;  %v1640_v36 = vpop.permute.xlu0 %1639 }
 0x20a   : > { %1664 = vst.msk [vmem:[#allocation2] sm:$0xf] %vm1663_vm4, %v1640_v36  ;;  %v1361_v37 = vpop.f32.mrf.mxu0 }
 0x20b   : > { %1820 = vrot.lane.b32.xlu1 %v4131_v35, %s4662_s26 }
 0x20c   : > { %v1364_v38 = vpop.f32.mrf.mxu0 }
 0x20d   : > { %v4132_v39 = vpack.c.bf16 %v1364_v38, %v1364_v38  ;;  %v1642_v41 = vpop.permute.xlu1 %1641 }
 0x20e   : > { %1665 = vst.msk [vmem:[#allocation2 + $0x4] sm:$0xf] %vm1663_vm4, %v1642_v41  ;;  %v1366_v42 = vpop.f32.mrf.mxu0 }
 0x20f   : > { %1822 = vrot.lane.b32.xlu0 %v4132_v39, %s4662_s26 }
 0x210   : > { %v1367_v43 = vpop.f32.mrf.mxu0 }
 0x211   : > { %v4133_v44 = vpack.c.bf16 %v1367_v43, %v1367_v43  ;;  %v1644_v46 = vpop.permute.xlu0 %1643 }
 0x212   : > { %1666 = vst.msk [vmem:[#allocation2 + $0x8] sm:$0xf] %vm1663_vm4, %v1644_v46  ;;  %v1369_v48 = vpop.f32.mrf.mxu0  ;;  %v4664_v46 = vmov 0.0  }
 0x213   : > { %1824 = vrot.lane.b32.xlu1 %v4133_v44, %s4662_s26  ;;  %4280 = vmatprep.subr.bf16.mxu1 %v4664_v46  ;;  %s4670_s26 = smov 112  }
 0x214   : > { %v1372_v51 = vpop.f32.mrf.mxu0 }
 0x215   : > { %v4134_v52 = vpack.c.bf16 %v1372_v51, %v1372_v51  ;;  %v1646_v53 = vpop.permute.xlu1 %1645 }
 0x216   : > { %1667 = vst.msk [vmem:[#allocation2 + $0xc] sm:$0xf] %vm1663_vm4, %v1646_v53  ;;  %v1374_v56 = vpop.f32.mrf.mxu0 }
 0x217   : > { %1867 = vrot.lane.b32.xlu0 %v4134_v52, %s4663_s1  ;;  %v3926_v52 = vld [vmem:[%s5714_s3] ss:$0 sm:$0xff]  ;;  %s4666_s3 = smov 48  }
 0x218   : > { %v1375_v57 = vpop.f32.mrf.mxu0 }
 0x219   : > { %v4135_v58 = vpack.c.bf16 %v1375_v57, %v1375_v57  ;;  %v1648_v59 = vpop.permute.xlu0 %1647 }
 0x21a   : > { %1668 = vst.msk [vmem:[#allocation2 + $0x10] sm:$0xf] %vm1663_vm4, %v1648_v59  ;;  %v1377_v61 = vpop.f32.mrf.mxu0 }
 0x21b   : > { %1869 = vrot.lane.b32.xlu1 %v4135_v58, %s4663_s1 }
 0x21c   : > { %v1380_v62 = vpop.f32.mrf.mxu0 }
 0x21d   : > { %v4136_v63 = vpack.c.bf16 %v1380_v62, %v1380_v62  ;;  %v1650_v0 = vpop.permute.xlu1 %1649 }
 0x21e   : > { %1669 = vst.msk [vmem:[#allocation2 + $0x14] sm:$0xf] %vm1663_vm4, %v1650_v0  ;;  %v1382_v2 = vpop.f32.mrf.mxu0 }
 0x21f   : > { %1871 = vrot.lane.b32.xlu0 %v4136_v63, %s4663_s1 }
 0x220   : > { %v1383_v3 = vpop.f32.mrf.mxu0 }
 0x221   : > { %v4137_v5 = vpack.c.bf16 %v1383_v3, %v1383_v3  ;;  %v1652_v6 = vpop.permute.xlu0 %1651 }
 0x222   : > { %1670 = vst.msk [vmem:[#allocation2 + $0x18] sm:$0xf] %vm1663_vm4, %v1652_v6  ;;  %v1385_v7 = vpop.f32.mrf.mxu0 }
 0x223   : > { %1875 = vrot.lane.b32.xlu0 %v4138_v4, %s4663_s1  ;;  %1873 = vrot.lane.b32.xlu1 %v4137_v5, %s4663_s1 }
 0x225   : > { %v1654_v10 = vpop.permute.xlu1 %1653 }
 0x226   : > { %1671 = vst.msk [vmem:[#allocation2 + $0x1c] sm:$0xf] %vm1663_vm4, %v1654_v10  ;;  %v3938_v10 = vld [vmem:[%s5689_s4] ss:$0 sm:$0xff]  ;;  %vm2381_vm4 = vcmask 1044352  }
 0x227   : > { %1879 = vrot.lane.b32.xlu0 %v4140_v8, %s4663_s1  ;;  %1877 = vrot.lane.b32.xlu1 %v4139_v9, %s4663_s1 }
 0x229   : > { %v1697_v11 = vpop.permute.xlu0 %1696 }
 0x22a   : > { %1721 = vst.msk [vmem:[#allocation2] sm:$0xf] %vm1720_vm6, %v1697_v11 }
 0x22b   : > { %1881 = vrot.lane.b32.xlu1 %v4141_v40, %s4663_s1 }
 0x22d   : > { %v1699_v50 = vpop.permute.xlu1 %1698 }
 0x22e   : > { %1722 = vst.msk [vmem:[#allocation2 + $0x4] sm:$0xf] %vm1720_vm6, %v1699_v50 }
 0x231   : > { %v1701_v45 = vpop.permute.xlu0 %1700 }
 0x232   : > { %1723 = vst.msk [vmem:[#allocation2 + $0x8] sm:$0xf] %vm1720_vm6, %v1701_v45 }
 0x235   : > { %v1703_v12 = vpop.permute.xlu1 %1702 }
 0x236   : > { %1724 = vst.msk [vmem:[#allocation2 + $0xc] sm:$0xf] %vm1720_vm6, %v1703_v12 }
 0x239   : > { %v1705_v13 = vpop.permute.xlu0 %1704 }
 0x23a   : > { %1725 = vst.msk [vmem:[#allocation2 + $0x10] sm:$0xf] %vm1720_vm6, %v1705_v13 }
 0x23d   : > { %v1707_v14 = vpop.permute.xlu1 %1706 }
 0x23e   : > { %1726 = vst.msk [vmem:[#allocation2 + $0x14] sm:$0xf] %vm1720_vm6, %v1707_v14 }
 0x241   : > { %v1709_v55 = vpop.permute.xlu0 %1708 }
 0x242   : > { %1727 = vst.msk [vmem:[#allocation2 + $0x18] sm:$0xf] %vm1720_vm6, %v1709_v55 }
 0x245   : > { %v1711_v15 = vpop.permute.xlu1 %1710 }
 0x246   : > { %1728 = vst.msk [vmem:[#allocation2 + $0x1c] sm:$0xf] %vm1720_vm6, %v1711_v15  ;;  %vm2484_vm6 = vcmask 130048  }
 0x249   : > { %v1754_v16 = vpop.permute.xlu0 %1753 }
 0x24a   : > { %1778 = vst.msk [vmem:[#allocation2] sm:$0xf] %vm1777_vm7, %v1754_v16 }
 0x24d   : > { %v1756_v17 = vpop.permute.xlu1 %1755 }
 0x24e   : > { %1779 = vst.msk [vmem:[#allocation2 + $0x4] sm:$0xf] %vm1777_vm7, %v1756_v17 }
 0x251   : > { %v1758_v18 = vpop.permute.xlu0 %1757 }
 0x252   : > { %1780 = vst.msk [vmem:[#allocation2 + $0x8] sm:$0xf] %vm1777_vm7, %v1758_v18 }
 0x255   : > { %v1760_v19 = vpop.permute.xlu1 %1759 }
 0x256   : > { %1781 = vst.msk [vmem:[#allocation2 + $0xc] sm:$0xf] %vm1777_vm7, %v1760_v19 }
 0x259   : > { %v1762_v20 = vpop.permute.xlu0 %1761 }
 0x25a   : > { %1782 = vst.msk [vmem:[#allocation2 + $0x10] sm:$0xf] %vm1777_vm7, %v1762_v20 }
 0x25d   : > { %v1764_v21 = vpop.permute.xlu1 %1763 }
 0x25e   : > { %1783 = vst.msk [vmem:[#allocation2 + $0x14] sm:$0xf] %vm1777_vm7, %v1764_v21 }
 0x261   : > { %v1766_v22 = vpop.permute.xlu0 %1765 }
 0x262   : > { %1784 = vst.msk [vmem:[#allocation2 + $0x18] sm:$0xf] %vm1777_vm7, %v1766_v22 }
 0x265   : > { %v1768_v23 = vpop.permute.xlu1 %1767 }
 0x266   : > { %1785 = vst.msk [vmem:[#allocation2 + $0x1c] sm:$0xf] %vm1777_vm7, %v1768_v23  ;;  %vm2663_vm7 = vcmask 254976  }
 0x269   : > { %v1811_v24 = vpop.permute.xlu0 %1810 }
 0x26a   : > { %1835 = vst.msk [vmem:[#allocation2] sm:$0xf] %vm1834_vm8, %v1811_v24 }
 0x26d   : > { %v1813_v25 = vpop.permute.xlu1 %1812 }
 0x26e   : > { %1836 = vst.msk [vmem:[#allocation2 + $0x4] sm:$0xf] %vm1834_vm8, %v1813_v25 }
 0x271   : > { %v1815_v26 = vpop.permute.xlu0 %1814 }
 0x272   : > { %1837 = vst.msk [vmem:[#allocation2 + $0x8] sm:$0xf] %vm1834_vm8, %v1815_v26 }
 0x275   : > { %v1817_v27 = vpop.permute.xlu1 %1816 }
 0x276   : > { %1838 = vst.msk [vmem:[#allocation2 + $0xc] sm:$0xf] %vm1834_vm8, %v1817_v27 }
 0x279   : > { %v1819_v28 = vpop.permute.xlu0 %1818 }
 0x27a   : > { %1839 = vst.msk [vmem:[#allocation2 + $0x10] sm:$0xf] %vm1834_vm8, %v1819_v28  ;;  %v4558_v28 = vld [vmem:[%s5690_s5] sm:$0xff]  }
 0x27d   : > { %v1821_v29 = vpop.permute.xlu1 %1820 }
 0x27e   : > { %1840 = vst.msk [vmem:[#allocation2 + $0x14] sm:$0xf] %vm1834_vm8, %v1821_v29  ;;  %v4559_v29 = vld [vmem:[%s5690_s5 + $0x8] sm:$0xff]  }
 0x281   : > { %v1823_v30 = vpop.permute.xlu0 %1822 }
 0x282   : > { %1841 = vst.msk [vmem:[#allocation2 + $0x18] sm:$0xf] %vm1834_vm8, %v1823_v30  ;;  %v4560_v30 = vld [vmem:[%s5690_s5 + $0x10] sm:$0xff]  }
 0x285   : > { %v1825_v31 = vpop.permute.xlu1 %1824 }
 0x286   : > { %1842 = vst.msk [vmem:[#allocation2 + $0x1c] sm:$0xf] %vm1834_vm8, %v1825_v31  ;;  %v4561_v31 = vld [vmem:[%s5690_s5 + $0x18] sm:$0xff]   ;;  %vm2677_vm8 = vcmask 517376  }
 0x289   : > { %v1868_v32 = vpop.permute.xlu0 %1867 }
 0x28a   : > { %1892 = vst.msk [vmem:[#allocation2] sm:$0xf] %vm1891_vm9, %v1868_v32  ;;  %v4562_v32 = vld [vmem:[%s5690_s5 + $0x20] sm:$0xff]  }
 0x28d   : > { %v1870_v33 = vpop.permute.xlu1 %1869 }
 0x28e   : > { %1893 = vst.msk [vmem:[#allocation2 + $0x4] sm:$0xf] %vm1891_vm9, %v1870_v33  ;;  %v4563_v33 = vld [vmem:[%s5690_s5 + $0x28] sm:$0xff]  }
 0x291   : > { %v1872_v34 = vpop.permute.xlu0 %1871 }
 0x292   : > { %1894 = vst.msk [vmem:[#allocation2 + $0x8] sm:$0xf] %vm1891_vm9, %v1872_v34  ;;  %v4564_v34 = vld [vmem:[%s5690_s5 + $0x30] sm:$0xff]  }
 0x295   : > { %v1876_v35 = vpop.permute.xlu0 %1875  ;;  %v1874_v36 = vpop.permute.xlu1 %1873  ;;  %v4553_v37 = vld [vmem:[#allocation2] sm:$0xff]  }
 0x296   : > { %1896 = vst.msk [vmem:[#allocation2 + $0x10] sm:$0xf] %vm1891_vm9, %v1876_v35  ;;  %1895 = vst.msk [vmem:[#allocation2 + $0xc] sm:$0xf] %vm1891_vm9, %v1874_v36  ;;  %4272 = vmatprep.mubr.msk.bf16.mxu1 %vm1955_vm10, %v4553_v37  ;;  %v4565_v35 = vld [vmem:[%s5690_s5 + $0x38] sm:$0xff]   ;;  %v4566_v36 = vld [vmem:[%s5690_s5 + $0x40] sm:$0xff]  }
 0x297   : > { %v4567_v37 = vld [vmem:[%s5691_s6 + $0x38] sm:$0xff]  }
 0x299   : > { %v1880_v38 = vpop.permute.xlu0 %1879  ;;  %v1878_v39 = vpop.permute.xlu1 %1877 }
 0x29a   : > { %1898 = vst.msk [vmem:[#allocation2 + $0x18] sm:$0xf] %vm1891_vm9, %v1880_v38  ;;  %1897 = vst.msk [vmem:[#allocation2 + $0x14] sm:$0xf] %vm1891_vm9, %v1878_v39 }
 0x29d   : > { %v1882_v41 = vpop.permute.xlu1 %1881  ;;  %v4555_v42 = vld [vmem:[#allocation2 + $0x8] sm:$0xff]  }
 0x29e   : > { %1899 = vst.msk [vmem:[#allocation2 + $0x1c] sm:$0xf] %vm1891_vm9, %v1882_v41  ;;  %4273 = vmatmul.mubr.msk.bf16.vlgmr.msra.gmra.mxu1 %vm1955_vm10, %v4555_v42  ;;  %v4568_v42 = vld [vmem:[%s5691_s6 + $0x30] sm:$0xff]   ;;  %vm2691_vm9 = vcmask 779776  }
 0x2a1   : > { %v4556_v43 = vld [vmem:[#allocation2 + $0x10] sm:$0xff]  }
 0x2a2   : > { %4276 = vmatprep.mubr.msk.bf16.mxu1 %vm1955_vm10, %v4556_v43 }
 0x2a5   : > { %v4557_v44 = vld [vmem:[#allocation2 + $0x18] sm:$0xff]  }
 0x2a6   : > { %4277 = vmatmul.mubr.msk.bf16.gmra.mxu1 %vm1955_vm10, %v4557_v44  ;;  %vm2705_vm10 = vcmask 1042176  }
 0x2a7   : > { %4288 = vmatprep.mubr.msk.bf16.mxu1 %vm4665_vm11, %v4664_v46 }
 0x35e   : > { %v4274_v47 = vpop.f32.mrf.mxu1 }
 0x35f   : > { %v2015_v63 = vadd.f32 %v4274_v47, %v3926_v52 }
 0x360   : > { %v2006_v48 = vpop.f32.mrf.mxu1 }
 0x361   : > { %v2039_v9 = vmul.f32 0.2, %v2015_v63  ;;  %v2007_v11 = vadd.f32 %v3926_v52, %v2006_v48 }
 0x362   : > { %v4275_v49 = vpop.f32.mrf.mxu1 }
 0x363   : > { %v2018_v60 = vadd.f32 %v4275_v49, %v3926_v52  ;;  %v2047_v16 = vmax.f32 %v2015_v63, %v2039_v9  ;;  %v2037_v17 = vmul.f32 0.2, %v2007_v11 }
 0x364   : > { %v2009_v51 = vpop.f32.mrf.mxu1 }
 0x365   : > { %v2040_v6 = vmul.f32 0.2, %v2018_v60  ;;  %v2010_v7 = vadd.f32 %v3926_v52, %v2009_v51  ;;  %v2062_v22 = vadd.f32 %v3938_v10, %v2047_v16  ;;  %v2045_v23 = vmax.f32 %v2007_v11, %v2037_v17 }
 0x366   : > { %v4278_v53 = vpop.f32.mrf.mxu1 }
 0x367   : > { %v2031_v54 = vadd.f32 %v4278_v53, %v3926_v52  ;;  %v2048_v13 = vmax.f32 %v2018_v60, %v2040_v6  ;;  %v2038_v14 = vmul.f32 0.2, %v2010_v7  ;;  %v2060_v26 = vadd.f32 %v3938_v10, %v2045_v23  ;;  %v4570_v60 = vld [vmem:[%s5691_s6 + $0x20] sm:$0xff]  }
 0x368   : > { %v2022_v56 = vpop.f32.mrf.mxu1  ;;  %v4575_v23 = vld [vmem:[%s5691_s6 + $0x40] sm:$0xff]  }
 0x369   : > { %v2043_v57 = vmul.f32 0.2, %v2031_v54  ;;  %v2023_v58 = vadd.f32 %v3926_v52, %v2022_v56  ;;  %v2063_v19 = vadd.f32 %v3938_v10, %v2048_v13  ;;  %v2046_v20 = vmax.f32 %v2010_v7, %v2038_v14 }
 0x36a   : > { %v4279_v59 = vpop.f32.mrf.mxu1 }
 0x36b   : > { %v2034_v61 = vadd.f32 %v4279_v59, %v3926_v52  ;;  %v2051_v2 = vmax.f32 %v2031_v54, %v2043_v57  ;;  %v2041_v3 = vmul.f32 0.2, %v2023_v58  ;;  %v2087_v24 = vpack.c.bf16 %v2063_v19, %v2062_v22 }
 0x36c   : > { %v2025_v62 = vpop.f32.mrf.mxu1  ;;  %v2061_v25 = vadd.f32 %v3938_v10, %v2046_v20 }
 0x36d   : > { %v2026_v0 = vadd.f32 %v3926_v52, %v2025_v62  ;;  %v2044_v4 = vmul.f32 0.2, %v2034_v61  ;;  %v2066_v50 = vadd.f32 %v3938_v10, %v2051_v2  ;;  %v2049_v45 = vmax.f32 %v2023_v58, %v2041_v3  ;;  %v4569_v52 = vld [vmem:[%s5691_s6 + $0x28] sm:$0xff]  }
 0x36e   : > { %v2086_v27 = vpack.c.bf16 %v2061_v25, %v2060_v26 }
 0x36f   : > { %v2042_v5 = vmul.f32 0.2, %v2026_v0  ;;  %v2052_v8 = vmax.f32 %v2034_v61, %v2044_v4  ;;  %v2064_v18 = vadd.f32 %v3938_v10, %v2049_v45  ;;  %v4571_v4 = vld [vmem:[%s5691_s6 + $0x18] sm:$0xff]  }
 0x371   : > { %v2050_v40 = vmax.f32 %v2026_v0, %v2042_v5  ;;  %v2067_v12 = vadd.f32 %v3938_v10, %v2052_v8 }
 0x373   : > { %v2089_v55 = vpack.c.bf16 %v2067_v12, %v2066_v50  ;;  %v2065_v15 = vadd.f32 %v3938_v10, %v2050_v40  ;;  %v4572_v40 = vld [vmem:[%s5691_s6 + $0x10] sm:$0xff]  }
 0x375   : > { %4281 = vmatpush3.bf16.msra.mxu1 %v2089_v55  ;;  %v2088_v21 = vpack.c.bf16 %v2065_v15, %v2064_v18  ;;  %v4573_v55 = vld [vmem:[%s5691_s6 + $0x8] sm:$0xff]  }
 0x376   : > { %4282 = vmatprep.subr.bf16.mxu1 %v4664_v46 }
 0x379   : > { %4283 = vmatpush3.bf16.msra.mxu1 %v2088_v21  ;;  %v4574_v21 = vld [vmem:[%s5691_s6] sm:$0xff]  }
 0x37a   : > { %4284 = vmatprep.subr.bf16.mxu1 %v4664_v46 }
 0x37d   : > { %4285 = vmatpush3.bf16.msra.mxu1 %v2087_v24 }
 0x37e   : > { %4286 = vmatprep.subr.bf16.mxu1 %v4664_v46 }
 0x381   : > { %4287 = vmatpush3.bf16.msra.mxu1 %v2086_v27 }
 0x382   : > { %2488 = vmatprep.subr.bf16.mxu1 %v4655_v1 }
 0x384   : > { %4289 = vmatmul.mubr.msk.bf16.vlgmr.msra.gmra.mxu1 %vm2135_vm12, %v4558_v28 }
 0x385   : > { %4292 = vmatprep.mubr.msk.bf16.mxu1 %vm4665_vm11, %v4664_v46  ;;  %2489 = vmatpush1.bf16.msra.mxu1 %v4567_v37 }
 0x386   : > { %2490 = vmatprep.subr.bf16.mxu1 %v4655_v1 }
 0x389   : > { %2491 = vmatpush1.bf16.msra.mxu1 %v4568_v42 }
 0x38a   : > { %2492 = vmatprep.subr.bf16.mxu1 %v4655_v1 }
 0x38c   : > { %4293 = vmatmul.mubr.msk.bf16.gmra.mxu1 %vm2135_vm12, %v4559_v29 }
 0x38d   : > { %4296 = vmatprep.mubr.msk.bf16.mxu1 %vm4665_vm11, %v4664_v46  ;;  %2493 = vmatpush1.bf16.msra.mxu1 %v4569_v52 }
 0x38e   : > { %2494 = vmatprep.subr.bf16.mxu1 %v4655_v1 }
 0x391   : > { %2495 = vmatpush1.bf16.msra.mxu1 %v4570_v60 }
 0x392   : > { %2496 = vmatprep.subr.bf16.mxu1 %v4655_v1 }
 0x394   : > { %4297 = vmatmul.mubr.msk.bf16.gmra.mxu1 %vm2135_vm12, %v4560_v30 }
 0x395   : > { %4300 = vmatprep.mubr.msk.bf16.mxu1 %vm4665_vm11, %v4664_v46  ;;  %2497 = vmatpush1.bf16.msra.mxu1 %v4571_v4 }
 0x396   : > { %2498 = vmatprep.subr.bf16.mxu1 %v4655_v1 }
 0x399   : > { %2499 = vmatpush1.bf16.msra.mxu1 %v4572_v40  ;;  %v4580_v40 = vld [vmem:[%s5694_s9 + $0x8] sm:$0xff]  }
 0x39a   : > { %2500 = vmatprep.subr.bf16.mxu1 %v4655_v1 }
 0x39c   : > { %4301 = vmatmul.mubr.msk.bf16.gmra.mxu1 %vm2135_vm12, %v4561_v31 }
 0x39d   : > { %4304 = vmatprep.mubr.msk.bf16.mxu1 %vm4665_vm11, %v4664_v46  ;;  %2501 = vmatpush1.bf16.msra.mxu1 %v4573_v55  ;;  %v4584_v55 = vld [vmem:[%s5695_s10 + $0x78] sm:$0xff]  }
 0x39e   : > { %2502 = vmatprep.subr.bf16.mxu1 %v4655_v1 }
 0x3a1   : > { %2503 = vmatpush1.bf16.msra.mxu1 %v4574_v21 }
 0x3a2   : > { %2518 = vmatprep.subr.bf16.mxu1 %v4655_v1 }
 0x3a4   : > { %4305 = vmatmul.mubr.msk.bf16.gmra.mxu1 %vm2135_vm12, %v4562_v32 }
 0x3a5   : > { %4308 = vmatprep.mubr.msk.bf16.mxu1 %vm4665_vm11, %v4664_v46  ;;  %2519 = vmatpush2.bf16.msra.mxu1 %v4575_v23 }
 0x3a6   : > { %4324 = vmatprep.subr.bf16.mxu1 %v4664_v46 }
 0x3ac   : > { %4309 = vmatmul.mubr.msk.bf16.gmra.mxu1 %vm2135_vm12, %v4563_v33 }
 0x3ad   : > { %4312 = vmatprep.mubr.msk.bf16.mxu1 %vm4665_vm11, %v4664_v46 }
 0x3b4   : > { %4313 = vmatmul.mubr.msk.bf16.gmra.mxu1 %vm2135_vm12, %v4564_v34 }
 0x3b5   : > { %4316 = vmatprep.mubr.msk.bf16.mxu1 %vm4665_vm11, %v4664_v46 }
 0x3bc   : > { %4317 = vmatmul.mubr.msk.bf16.gmra.mxu1 %vm2135_vm12, %v4565_v35 }
 0x3bd   : > { %4320 = vmatprep.mubr.msk.bf16.mxu1 %vm4665_vm11, %v4664_v46 }
 0x3c4   : > { %4321 = vmatmul.mubr.msk.bf16.gmra.mxu1 %vm2135_vm12, %v4566_v36 }
 0x444   : > { %v2197_v38 = vpop.f32.mrf.mxu1 }
 0x445   : > { %v4142_v39 = vpack.c.bf16 %v2197_v38, %v2197_v38 }
 0x446   : > { %v4290_v41 = vpop.f32.mrf.mxu1 }
 0x447   : > { %2277 = vst.msk [vmem:[#allocation3] sm:$0xf] %vm2276_vm13, %v4142_v39 }
 0x448   : > { %v2200_v43 = vpop.f32.mrf.mxu1 }
 0x449   : > { %v4143_v44 = vpack.c.bf16 %v2200_v43, %v2200_v43 }
 0x44a   : > { %v4291_v47 = vpop.f32.mrf.mxu1 }
 0x44b   : > { %2278 = vst.msk [vmem:[#allocation3 + $0x8] sm:$0xf] %vm2276_vm13, %v4143_v44 }
 0x44c   : > { %v2205_v48 = vpop.f32.mrf.mxu1 }
 0x44d   : > { %v4144_v49 = vpack.c.bf16 %v2205_v48, %v2205_v48 }
 0x44e   : > { %v4294_v51 = vpop.f32.mrf.mxu1 }
 0x44f   : > { %2285 = vrot.lane.b32.xlu0 %v4144_v49, %s4659_s24 }
 0x450   : > { %v2208_v53 = vpop.f32.mrf.mxu1 }
 0x451   : > { %v4145_v54 = vpack.c.bf16 %v2208_v53, %v2208_v53 }
 0x452   : > { %v4295_v56 = vpop.f32.mrf.mxu1 }
 0x453   : > { %2287 = vrot.lane.b32.xlu1 %v4145_v54, %s4659_s24  ;;  %s4669_s24 = smov 96  }
 0x454   : > { %v2213_v57 = vpop.f32.mrf.mxu1 }
 0x455   : > { %v4146_v58 = vpack.c.bf16 %v2213_v57, %v2213_v57 }
 0x456   : > { %v4298_v59 = vpop.f32.mrf.mxu1 }
 0x457   : > { %2300 = vrot.lane.b32.xlu0 %v4146_v58, %s4663_s1  ;;  %v3975_v58 = vld [vmem:[%s5692_s7] ss:$0 sm:$0xff] }
 0x458   : > { %v2216_v61 = vpop.f32.mrf.mxu1 }
 0x459   : > { %v4147_v62 = vpack.c.bf16 %v2216_v61, %v2216_v61 }
 0x45a   : > { %v4299_v63 = vpop.f32.mrf.mxu1 }
 0x45b   : > { %2302 = vrot.lane.b32.xlu1 %v4147_v62, %s4663_s1 }
 0x45c   : > { %v2221_v0 = vpop.f32.mrf.mxu1 }
 0x45d   : > { %v4148_v2 = vpack.c.bf16 %v2221_v0, %v2221_v0 }
 0x45e   : > { %v4302_v3 = vpop.f32.mrf.mxu1 }
 0x45f   : > { %2315 = vrot.lane.b32.xlu0 %v4148_v2, %s4666_s3 }
 0x460   : > { %v2224_v5 = vpop.f32.mrf.mxu1 }
 0x461   : > { %v4149_v6 = vpack.c.bf16 %v2224_v5, %v2224_v5  ;;  %v3988_v5 = vld [vmem:[%s5693_s8] ss:$0 sm:$0xff] }
 0x462   : > { %v4303_v7 = vpop.f32.mrf.mxu1 }
 0x463   : > { %2317 = vrot.lane.b32.xlu1 %v4149_v6, %s4666_s3 }
 0x464   : > { %v2229_v8 = vpop.f32.mrf.mxu1 }
 0x465   : > { %v4150_v9 = vpack.c.bf16 %v2229_v8, %v2229_v8 }
 0x466   : > { %v4306_v10 = vpop.f32.mrf.mxu1 }
 0x467   : > { %2330 = vrot.lane.b32.xlu0 %v4150_v9, %s4667_s29  ;;  %v4579_v10 = vld [vmem:[%s5694_s9] sm:$0xff]  }
 0x468   : > { %v2232_v11 = vpop.f32.mrf.mxu1 }
 0x469   : > { %v4151_v50 = vpack.c.bf16 %v2232_v11, %v2232_v11  ;;  %v4581_v11 = vld [vmem:[%s5694_s9 + $0x10] sm:$0xff]  }
 0x46a   : > { %v4307_v45 = vpop.f32.mrf.mxu1 }
 0x46b   : > { %2332 = vrot.lane.b32.xlu1 %v4151_v50, %s4667_s29  ;;  %v4582_v50 = vld [vmem:[%s5694_s9 + $0x18] sm:$0xff]   ;;  %v4583_v45 = vld [vmem:[%s5694_s9 + $0x20] ss:$0 sps:$4 sm:$0xff]  }
 0x46c   : > { %v2237_v12 = vpop.f32.mrf.mxu1 }
 0x46d   : > { %v4152_v13 = vpack.c.bf16 %v2237_v12, %v2237_v12  ;;  %v4671_v12 = vmov 1983009808  }
 0x46e   : > { %v4310_v14 = vpop.f32.mrf.mxu1 }
 0x46f   : > { %2345 = vrot.lane.b32.xlu0 %v4152_v13, %s4668_s2  ;;  %v2668_v13 = vunpack.c.l.s4 %v4671_v12  ;;  %v2670_v14 = vlaneseq }
 0x470   : > { %v2240_v15 = vpop.f32.mrf.mxu1 }
 0x471   : > { %v4153_v16 = vpack.c.bf16 %v2240_v15, %v2240_v15  ;;  %v4585_v15 = vld [vmem:[%s5695_s10 + $0x38] sm:$0xff]  }
 0x472   : > { %v4311_v17 = vpop.f32.mrf.mxu1 }
 0x473   : > { %2347 = vrot.lane.b32.xlu1 %v4153_v16, %s4668_s2  ;;  %v2669_v16 = vunpack.c.0.s8 %v2668_v13  ;;  %v5399_v17 = vshrl.u32 %v2670_v14, 7 }
 0x474   : > { %v2245_v18 = vpop.f32.mrf.mxu1 }
 0x475   : > { %v4154_v19 = vpack.c.bf16 %v2245_v18, %v2245_v18  ;;  %v5409_v23 = vsub.s32 %v2669_v16, %v5399_v17 }
 0x476   : > { %v4314_v20 = vpop.f32.mrf.mxu1 }
 0x477   : > { %2360 = vrot.lane.b32.xlu0 %v4154_v19, %s4669_s24  ;;  %v4586_v19 = vld [vmem:[%s5695_s10 + $0x70] sm:$0xff]  }
 0x478   : > { %v2248_v22 = vpop.f32.mrf.mxu1  ;;  %v4587_v20 = vld [vmem:[%s5695_s10 + $0x30] sm:$0xff]  }
 0x479   : > { %v4155_v24 = vpack.c.bf16 %v2248_v22, %v2248_v22 }
 0x47a   : > { %v4315_v25 = vpop.f32.mrf.mxu1 }
 0x47b   : > { %2362 = vrot.lane.b32.xlu1 %v4155_v24, %s4669_s24  ;;  %v4588_v25 = vld [vmem:[%s5695_s10 + $0x68] sm:$0xff]  }
 0x47c   : > { %v2253_v26 = vpop.f32.mrf.mxu1 }
 0x47d   : > { %v4156_v27 = vpack.c.bf16 %v2253_v26, %v2253_v26  ;;  %v4589_v26 = vld [vmem:[%s5695_s10 + $0x28] sm:$0xff]  }
 0x47e   : > { %v4318_v28 = vpop.f32.mrf.mxu1 }
 0x47f   : > { %2375 = vrot.lane.b32.xlu0 %v4156_v27, %s4670_s26 }
 0x480   : > { %v2256_v29 = vpop.f32.mrf.mxu1 }
 0x481   : > { %v4157_v30 = vpack.c.bf16 %v2256_v29, %v2256_v29 }
 0x482   : > { %v4319_v31 = vpop.f32.mrf.mxu1 }
 0x483   : > { %2377 = vrot.lane.b32.xlu1 %v4157_v30, %s4670_s26 }
 0x484   : > { %v2261_v32 = vpop.f32.mrf.mxu1 }
 0x485   : > { %v4158_v33 = vpack.c.bf16 %v2261_v32, %v2261_v32 }
 0x486   : > { %v4322_v34 = vpop.f32.mrf.mxu1 }
 0x487   : > { %2392 = vst.msk [vmem:[#allocation3 + $0x4] sm:$0xf] %vm2276_vm13, %v4158_v33  ;;  %v4590_v34 = vld [vmem:[%s5695_s10 + $0x60] sm:$0xff]  }
 0x488   : > { %v2264_v1 = vpop.f32.mrf.mxu1 }
 0x489   : > { %v4159_v35 = vpack.c.bf16 %v2264_v1, %v2264_v1 }
 0x48a   : > { %v4323_v36 = vpop.f32.mrf.mxu1 }
 0x48b   : > { %2393 = vst.msk [vmem:[#allocation3 + $0xc] sm:$0xf] %vm2276_vm13, %v4159_v35  ;;  %v4591_v35 = vld [vmem:[%s5695_s10 + $0x20] sm:$0xff]   ;;  %vm2921_vm13 = vcmask 261120  }
 0x492   : > { %v4578_v57 = vld [vmem:[#allocation3 + $0x4] ss:$8 sps:$4 sm:$0xff]  }
 0x493   : > { %3987 = vmatprep.mubr.msk.bf16.mxu1 %vm2484_vm6, %v4578_v57  ;;  %v4598_v57 = vld [vmem:[%s5695_s10 + $0x40] sm:$0xff]  }
 0x4c1   : > { %v2286_v37 = vpop.permute.xlu0 %2285 }
 0x4c2   : > { %2292 = vst.msk [vmem:[#allocation3] sm:$0xf] %vm2291_vm14, %v2286_v37 }
 0x4c5   : > { %v2288_v38 = vpop.permute.xlu1 %2287 }
 0x4c6   : > { %2293 = vst.msk [vmem:[#allocation3 + $0x8] sm:$0xf] %vm2291_vm14, %v2288_v38  ;;  %vm3048_vm14 = vcmask 31744  }
 0x4c9   : > { %v2301_v39 = vpop.permute.xlu0 %2300 }
 0x4ca   : > { %2307 = vst.msk [vmem:[#allocation3] sm:$0xf] %vm2306_vm15, %v2301_v39  ;;  %v4592_v39 = vld [vmem:[%s5695_s10 + $0x58] sm:$0xff]  }
 0x4cd   : > { %v2303_v41 = vpop.permute.xlu1 %2302 }
 0x4ce   : > { %2308 = vst.msk [vmem:[#allocation3 + $0x8] sm:$0xf] %vm2306_vm15, %v2303_v41  ;;  %vm3141_vm15 = vsmask.f32 256 }
 0x4d1   : > { %v2316_v42 = vpop.permute.xlu0 %2315 }
 0x4d2   : > { %2322 = vst.msk [vmem:[#allocation3] sm:$0xf] %vm2321_vm0, %v2316_v42  ;;  %v4593_v42 = vld [vmem:[%s5695_s10 + $0x18] sm:$0xff]  }
 0x4d5   : > { %v2318_v43 = vpop.permute.xlu1 %2317 }
 0x4d6   : > { %2323 = vst.msk [vmem:[#allocation3 + $0x8] sm:$0xf] %vm2321_vm0, %v2318_v43 }
 0x4d9   : > { %v2331_v44 = vpop.permute.xlu0 %2330 }
 0x4da   : > { %2337 = vst.msk [vmem:[#allocation3] sm:$0xf] %vm2336_vm1, %v2331_v44 }
 0x4dd   : > { %v2333_v47 = vpop.permute.xlu1 %2332 }
 0x4de   : > { %2338 = vst.msk [vmem:[#allocation3 + $0x8] sm:$0xf] %vm2336_vm1, %v2333_v47  ;;  %v4594_v47 = vld [vmem:[%s5695_s10 + $0x50] sm:$0xff]   ;;  %vm3165_vm1 = vcmask 1040896  }
 0x4e1   : > { %v2346_v48 = vpop.permute.xlu0 %2345 }
 0x4e2   : > { %2352 = vst.msk [vmem:[#allocation3] sm:$0xf] %vm2351_vm2, %v2346_v48 }
 0x4e5   : > { %v2348_v49 = vpop.permute.xlu1 %2347 }
 0x4e6   : > { %2353 = vst.msk [vmem:[#allocation3 + $0x8] sm:$0xf] %vm2351_vm2, %v2348_v49  ;;  %v4595_v49 = vld [vmem:[%s5695_s10 + $0x10] sm:$0xff]   ;;  %vm5588_vm2 = vmand %vm3165_vm1, %vm3141_vm15 }
 0x4e9   : > { %v2361_v51 = vpop.permute.xlu0 %2360 }
 0x4ea   : > { %2367 = vst.msk [vmem:[#allocation3] sm:$0xf] %vm2366_vm3, %v2361_v51  ;;  %v4596_v51 = vld [vmem:[%s5695_s10 + $0x48] sm:$0xff]  }
 0x4ed   : > { %v2363_v52 = vpop.permute.xlu1 %2362 }
 0x4ee   : > { %2368 = vst.msk [vmem:[#allocation3 + $0x8] sm:$0xf] %vm2366_vm3, %v2363_v52 }
 0x4f1   : > { %v2376_v53 = vpop.permute.xlu0 %2375 }
 0x4f2   : > { %2382 = vst.msk [vmem:[#allocation3] sm:$0xf] %vm2381_vm4, %v2376_v53 }
 0x4f5   : > { %v2378_v54 = vpop.permute.xlu1 %2377 }
 0x4f6   : > { %2383 = vst.msk [vmem:[#allocation3 + $0x8] sm:$0xf] %vm2381_vm4, %v2378_v54  ;;  %v4597_v54 = vld [vmem:[%s5695_s10 + $0x8] sm:$0xff]  }
 0x4fd   : > { %v4576_v56 = vld [vmem:[#allocation3] ss:$8 sps:$4 sm:$0xff]  }
 0x4fe   : > { %2521 = vmatmul.mubr.bf16.vlgmr.msra.gmra.mxu1 %v4576_v56 }
 0x4ff   : > { %4326 = vmatprep.mubr.msk.bf16.mxu1 %vm4665_vm11, %v4664_v46 }
 0x5be   : > { %v2522_v59 = vpop.f32.mrf.mxu1 }
 0x5bf   : > { %v2523_v60 = vadd.f32 %v3975_v58, %v2522_v59 }
 0x5c0   : > { %v2524_v61 = vpop.f32.mrf.mxu1 }
 0x5c1   : > { %v2529_v62 = vmul.f32 0.2, %v2523_v60  ;;  %v4599_v61 = vld [vmem:[%s5695_s10] sm:$0xff]  }
 0x5c2   : > { %v2525_v63 = vpop.f32.mrf.mxu1 }
 0x5c3   : > { %v2526_v0 = vadd.f32 %v3975_v58, %v2525_v63  ;;  %v2531_v3 = vmax.f32 %v2523_v60, %v2529_v62 }
 0x5c4   : > { %v2527_v2 = vpop.f32.mrf.mxu1 }
 0x5c5   : > { %v2530_v4 = vmul.f32 0.2, %v2526_v0  ;;  %v2540_v7 = vadd.f32 %v3988_v5, %v2531_v3 }
 0x5c7   : > { %v2532_v6 = vmax.f32 %v2526_v0, %v2530_v4 }
 0x5c9   : > { %v2541_v8 = vadd.f32 %v3988_v5, %v2532_v6 }
 0x5cb   : > { %v2551_v9 = vpack.c.bf16 %v2541_v8, %v2540_v7 }
 0x5cd   : > { %4325 = vmatpush3.bf16.msra.mxu1 %v2551_v9 }
 0x5ce   : > { %4186 = vmatprep.subr.bf16.mxu1 %v4584_v55  ;;  %v4601_v55 = vld [vmem:[%s5695_s10 + $0x88] sm:$0xff]  }
 0x5d0   : > { %4327 = vmatmul.mubr.msk.bf16.vlgmr.msra.gmra.mxu1 %vm2484_vm6, %v4579_v10 }
 0x5d1   : > { %4330 = vmatprep.mubr.msk.bf16.mxu1 %vm4665_vm11, %v4664_v46  ;;  %4187 = vmatpush3.bf16.msra.mxu1 %v4585_v15  ;;  %v4602_v15 = vld [vmem:[%s5695_s10 + $0x80] sm:$0xff]  }
 0x5d2   : > { %4188 = vmatprep.subr.bf16.mxu1 %v4586_v19 }
 0x5d5   : > { %4189 = vmatpush3.bf16.msra.mxu1 %v4587_v20 }
 0x5d6   : > { %4190 = vmatprep.subr.bf16.mxu1 %v4588_v25 }
 0x5d8   : > { %4331 = vmatmul.mubr.msk.bf16.gmra.mxu1 %vm2484_vm6, %v4580_v40 }
 0x5d9   : > { %4334 = vmatprep.mubr.msk.bf16.mxu1 %vm4665_vm11, %v4664_v46  ;;  %4191 = vmatpush3.bf16.msra.mxu1 %v4589_v26 }
 0x5da   : > { %4192 = vmatprep.subr.bf16.mxu1 %v4590_v34 }
 0x5dd   : > { %4193 = vmatpush3.bf16.msra.mxu1 %v4591_v35 }
 0x5de   : > { %4194 = vmatprep.subr.bf16.mxu1 %v4592_v39  ;;  %v4606_v39 = vld [vmem:[%s5698_s13 + $0x18] sm:$0xff]  }
 0x5e0   : > { %4335 = vmatmul.mubr.msk.bf16.gmra.mxu1 %vm2484_vm6, %v4581_v11 }
 0x5e1   : > { %4338 = vmatprep.mubr.msk.bf16.mxu1 %vm4665_vm11, %v4664_v46  ;;  %4195 = vmatpush3.bf16.msra.mxu1 %v4593_v42  ;;  %v4672_v42 = vmov 1966171168  }
 0x5e2   : > { %4196 = vmatprep.subr.bf16.mxu1 %v4594_v47  ;;  %v4608_v47 = vld [vmem:[%s5699_s14 + $0x78] sm:$0xff]  }
 0x5e5   : > { %4197 = vmatpush3.bf16.msra.mxu1 %v4595_v49 }
 0x5e6   : > { %4198 = vmatprep.subr.bf16.mxu1 %v4596_v51 }
 0x5e8   : > { %4339 = vmatmul.mubr.msk.bf16.gmra.mxu1 %vm2484_vm6, %v4582_v50 }
 0x5e9   : > { %4342 = vmatprep.mubr.msk.bf16.mxu1 %vm4665_vm11, %v4664_v46  ;;  %4199 = vmatpush3.bf16.msra.mxu1 %v4597_v54 }
 0x5ea   : > { %4200 = vmatprep.subr.bf16.mxu1 %v4598_v57 }
 0x5ed   : > { %4201 = vmatpush3.bf16.msra.mxu1 %v4599_v61 }
 0x5ee   : > { %4346 = vmatprep.subr.bf16.mxu1 %v4664_v46 }
 0x5f0   : > { %4343 = vmatmul.mubr.msk.bf16.gmra.mxu1 %vm2484_vm6, %v4583_v45 }
 0x690   : > { %v2624_v18 = vpop.f32.mrf.mxu1 }
 0x691   : > { %v2662_v21 = vpack.c.bf16 %v2624_v18, %v2624_v18 }
 0x692   : > { %v4328_v22 = vpop.f32.mrf.mxu1 }
 0x693   : > { %2664 = vst.msk [vmem:[#allocation4] sm:$0x3] %vm2663_vm7, %v2662_v21 }
 0x694   : > { %v2627_v24 = vpop.f32.mrf.mxu1 }
 0x695   : > { %v2665_v27 = vpack.c.bf16 %v2627_v24, %v2627_v24  ;;  %v3999_v24 = vld [vmem:[%s5696_s11] ss:$0 sm:$0xff] }
 0x696   : > { %v4329_v28 = vpop.f32.mrf.mxu1 }
 0x697   : > { %v2673_v29 = vrot.slane %v2665_v27, %v5409_v23 }
 0x698   : > { %v2632_v30 = vpop.f32.mrf.mxu1 }
 0x699   : > { %v2679_v31 = vpack.c.bf16 %v2632_v30, %v2632_v30  ;;  %2674 = vrot.lane.b32.xlu0 %v2673_v29, %s4663_s1  ;;  %v4019_v30 = vld [vmem:[%s5697_s12] ss:$0 sm:$0xff] }
 0x69a   : > { %v4332_v32 = vpop.f32.mrf.mxu1 }
 0x69b   : > { %v2687_v33 = vrot.slane %v2679_v31, %v5409_v23 }
 0x69c   : > { %v2635_v1 = vpop.f32.mrf.mxu1 }
 0x69d   : > { %v2693_v36 = vpack.c.bf16 %v2635_v1, %v2635_v1  ;;  %2688 = vrot.lane.b32.xlu0 %v2687_v33, %s4667_s29 }
 0x69e   : > { %v4333_v37 = vpop.f32.mrf.mxu1 }
 0x69f   : > { %v2701_v38 = vrot.slane %v2693_v36, %v5409_v23  ;;  %v4603_v36 = vld [vmem:[%s5698_s13] sm:$0xff]   ;;  %v4604_v37 = vld [vmem:[%s5698_s13 + $0x8] sm:$0xff]  }
 0x6a0   : > { %v2640_v41 = vpop.f32.mrf.mxu1 }
 0x6a1   : > { %v2707_v43 = vpack.c.bf16 %v2640_v41, %v2640_v41  ;;  %2702 = vrot.lane.b32.xlu0 %v2701_v38, %s4669_s24  ;;  %v4605_v38 = vld [vmem:[%s5698_s13 + $0x10] sm:$0xff]   ;;  %v4607_v41 = vld [vmem:[%s5698_s13 + $0x20] ss:$0 sps:$4 sm:$0xff]  }
 0x6a2   : > { %v4336_v44 = vpop.f32.mrf.mxu1 }
 0x6a3   : > { %2708 = vst.msk [vmem:[#allocation4 + $0x2] sm:$0x3] %vm2663_vm7, %v2707_v43  ;;  %v3149_v43 = vunpack.c.l.s4 %v4672_v42 }
 0x6a4   : > { %v2643_v48 = vpop.f32.mrf.mxu1 }
 0x6a5   : > { %v2709_v52 = vpack.c.bf16 %v2643_v48, %v2643_v48  ;;  %v3150_v44 = vunpack.c.0.s8 %v3149_v43  ;;  %v4609_v48 = vld [vmem:[%s5699_s14 + $0x38] sm:$0xff]  }
 0x6a6   : > { %v4337_v53 = vpop.f32.mrf.mxu1 }
 0x6a7   : > { %v2717_v56 = vrot.slane %v2709_v52, %v5409_v23  ;;  %v3143_v52 = vld [vmem:[#allocation5] sm:$0x1] }
 0x6a8   : > { %v2648_v58 = vpop.f32.mrf.mxu1 }
 0x6a9   : > { %v2722_v59 = vpack.c.bf16 %v2648_v58, %v2648_v58  ;;  %2718 = vrot.lane.b32.xlu1 %v2717_v56, %s4663_s1  ;;  %v5518_v56 = vsub.s32 %v3150_v44, %v5399_v17  ;;  %v4612_v17 = vld [vmem:[%s5699_s14 + $0x68] sm:$0xff]  }
 0x6aa   : > { %v4340_v60 = vpop.f32.mrf.mxu1 }
 0x6ab   : > { %v2730_v62 = vrot.slane %v2722_v59, %v5409_v23 }
 0x6ac   : > { %v2651_v63 = vpop.f32.mrf.mxu1 }
 0x6ad   : > { %v2735_v0 = vpack.c.bf16 %v2651_v63, %v2651_v63  ;;  %2731 = vrot.lane.b32.xlu1 %v2730_v62, %s4667_s29  ;;  %v4610_v62 = vld [vmem:[%s5699_s14 + $0x70] sm:$0xff]  }
 0x6ae   : > { %v4341_v2 = vpop.f32.mrf.mxu1  ;;  %v4611_v63 = vld [vmem:[%s5699_s14 + $0x30] sm:$0xff]  }
 0x6af   : > { %v2743_v3 = vrot.slane %v2735_v0, %v5409_v23  ;;  %v3171_v2 = vld [vmem:[#allocation5 + $0x1] sm:$0x1] }
 0x6b0   : > { %v2656_v4 = vpop.f32.mrf.mxu1 }
 0x6b1   : > { %2744 = vrot.lane.b32.xlu1 %v2743_v3, %s4669_s24  ;;  %v2748_v5 = vpack.c.bf16 %v2656_v4, %v2656_v4 }
 0x6b2   : > { %v4344_v6 = vpop.f32.mrf.mxu1 }
 0x6b3   : > { %2749 = vst.msk [vmem:[#allocation4 + $0x4] sm:$0x3] %vm2663_vm7, %v2748_v5  ;;  %v4613_v6 = vld [vmem:[%s5699_s14 + $0x28] sm:$0xff]  }
 0x6b4   : > { %v2659_v7 = vpop.f32.mrf.mxu1 }
 0x6b6   : > { %v4345_v8 = vpop.f32.mrf.mxu1 }
 0x70b   : > { %v2675_v9 = vpop.permute.xlu0 %2674 }
 0x70c   : > { %2678 = vst.msk [vmem:[#allocation4] sm:$0x3] %vm2677_vm8, %v2675_v9 }
 0x70f   : > { %v2689_v10 = vpop.permute.xlu0 %2688 }
 0x710   : > { %2692 = vst.msk [vmem:[#allocation4] sm:$0x3] %vm2691_vm9, %v2689_v10 }
 0x713   : > { %v2703_v40 = vpop.permute.xlu0 %2702 }
 0x714   : > { %2706 = vst.msk [vmem:[#allocation4] sm:$0x3] %vm2705_vm10, %v2703_v40 }
 0x71b   : > { %v2719_v11 = vpop.permute.xlu1 %2718 }
 0x71c   : > { %2721 = vst.msk [vmem:[#allocation4 + $0x2] sm:$0x3] %vm2677_vm8, %v2719_v11  ;;  %v4614_v11 = vld [vmem:[%s5699_s14 + $0x60] sm:$0xff]  }
 0x71f   : > { %v2732_v50 = vpop.permute.xlu1 %2731 }
 0x720   : > { %2734 = vst.msk [vmem:[#allocation4 + $0x2] sm:$0x3] %vm2691_vm9, %v2732_v50  ;;  %v4615_v50 = vld [vmem:[%s5699_s14 + $0x20] sm:$0xff]  }
 0x723   : > { %v2745_v45 = vpop.permute.xlu1 %2744 }
 0x724   : > { %2747 = vst.msk [vmem:[#allocation4 + $0x2] sm:$0x3] %vm2705_vm10, %v2745_v45 }
 0x72b   : > { %v2750_v12 = vld [vmem:[#allocation4] sm:$0x3f] }
 0x72c   : > { %v2802_v13 = vrot.slane %v2750_v12, %v5409_v23  ;;  %v2795_v16 = vcombine.high %v2750_v12, %v2750_v12  ;;  %v3197_v12 = vld [vmem:[#allocation5 + $0x2] sm:$0x1] }
 0x72e   : > { %v2810_v14 = vcombine.high %v2802_v13, %v2802_v13  ;;  %v2809_v18 = vrot.slane %v2795_v16, %v5409_v23 }
 0x730   : > { %2957 = vmatprep.mubr.bf16.mxu1 %v2810_v14 }
 0x731   : > { %2958 = vmatmul.mubr.bf16.vlgmr.msra.gmra.mxu1 %v2802_v13  ;;  %v4616_v13 = vld [vmem:[%s5699_s14 + $0x58] sm:$0xff]  }
 0x732   : > { %4347 = vmatpush3.bf16.msra.mxu1 %v4601_v55  ;;  %4350 = vmatprep.mubr.msk.bf16.mxu1 %vm4665_vm11, %v4664_v46 }
 0x733   : > { %4348 = vmatprep.subr.bf16.mxu1 %v4664_v46 }
 0x736   : > { %4349 = vmatpush3.bf16.msra.mxu1 %v4602_v15 }
 0x737   : > { %4354 = vmatprep.subr.bf16.mxu1 %v4664_v46 }
 0x739   : > { %4351 = vmatmul.mubr.msk.bf16.vlgmr.msra.gmra.mxu1 %vm2921_vm13, %v2809_v18 }
 0x73a   : > { %4356 = vmatprep.mubr.msk.bf16.mxu1 %vm4665_vm11, %v4664_v46 }
 0x7f1   : > { %v4202_v19 = vpop.f32.mrf.mxu1 }
 0x7f3   : > { %v4203_v20 = vpop.f32.mrf.mxu1 }
 0x7f4   : > { %v4204_v21 = vadd.f32 %v4203_v20, %v4202_v19  ;;  %v4617_v19 = vld [vmem:[%s5699_s14 + $0x18] sm:$0xff]  }
 0x7f5   : > { %v4205_v22 = vpop.f32.mrf.mxu1 }
 0x7f6   : > { %v2960_v26 = vadd.f32 %v4204_v21, %v3999_v24  ;;  %v4618_v24 = vld [vmem:[%s5699_s14 + $0x50] sm:$0xff]  }
 0x7f7   : > { %v4206_v25 = vpop.f32.mrf.mxu1 }
 0x7f8   : > { %v4619_v25 = vld [vmem:[%s5699_s14 + $0x10] sm:$0xff]  }
 0x7f9   : > { %v2999_v27 = vpop.f32.mrf.mxu1 }
 0x7fa   : > { %v3000_v28 = vadd.f32 %v2999_v27, %v2960_v26  ;;  %v4620_v26 = vld [vmem:[%s5699_s14 + $0x48] sm:$0xff]  }
 0x7fb   : > { %v4352_v29 = vpop.f32.mrf.mxu1 }
 0x7fc   : > { %v3005_v23 = vmul.f32 0.2, %v3000_v28 }
 0x7fd   : > { %v3002_v31 = vpop.f32.mrf.mxu1 }
 0x7fe   : > { %v3006_v32 = vmax.f32 %v3000_v28, %v3005_v23  ;;  %v3223_v28 = vld [vmem:[#allocation5 + $0x3] sm:$0x1]  ;;  %v4621_v31 = vld [vmem:[%s5699_s14 + $0x8] sm:$0xff]  }
 0x7ff   : > { %v4353_v33 = vpop.f32.mrf.mxu1 }
 0x800   : > { %v3014_v34 = vadd.f32 %v4019_v30, %v3006_v32  ;;  %v4622_v33 = vld [vmem:[%s5699_s14 + $0x40] sm:$0xff]  }
 0x802   : > { %v3024_v1 = vpack.c.bf16 %v3014_v34, %v3014_v34 }
 0x804   : > { %v3065_v35 = vsel %vm1968_vm5, %v3024_v1, 0  ;;  %vm3140_vm5 = vcmask 516096  }
 0x805   : > { %4355 = vmatpush3.bf16.msra.mxu1 %v3065_v35  ;;  %vm5513_vm0 = vmand %vm3140_vm5, %vm3141_vm15 }
 0x806   : > { %4217 = vmatprep.subr.bf16.mxu1 %v4608_v47  ;;  %v4625_v47 = vld [vmem:[%s5699_s14 + $0xf8] sm:$0xff]  }
 0x808   : > { %4357 = vmatmul.mubr.msk.bf16.vlgmr.msra.gmra.mxu1 %vm3048_vm14, %v4603_v36  ;;  %v4623_v36 = vld [vmem:[%s5699_s14] sm:$0xff]  }
 0x809   : > { %4360 = vmatprep.mubr.msk.bf16.mxu1 %vm4665_vm11, %v4664_v46  ;;  %4218 = vmatpush3.bf16.msra.mxu1 %v4609_v48 }
 0x80a   : > { %4219 = vmatprep.subr.bf16.mxu1 %v4610_v62 }
 0x80d   : > { %4220 = vmatpush3.bf16.msra.mxu1 %v4611_v63 }
 0x80e   : > { %4221 = vmatprep.subr.bf16.mxu1 %v4612_v17 }
 0x810   : > { %4361 = vmatmul.mubr.msk.bf16.gmra.mxu1 %vm3048_vm14, %v4604_v37 }
 0x811   : > { %4364 = vmatprep.mubr.msk.bf16.mxu1 %vm4665_vm11, %v4664_v46  ;;  %4222 = vmatpush3.bf16.msra.mxu1 %v4613_v6  ;;  %v4626_v6 = vld [vmem:[%s5699_s14 + $0xb8] sm:$0xff]  }
 0x812   : > { %4223 = vmatprep.subr.bf16.mxu1 %v4614_v11  ;;  %v4630_v11 = vld [vmem:[%s5699_s14 + $0xa8] sm:$0xff]  }
 0x815   : > { %4224 = vmatpush3.bf16.msra.mxu1 %v4615_v50  ;;  %v4631_v50 = vld [vmem:[%s5699_s14 + $0xe0] sm:$0xff]  }
 0x816   : > { %4225 = vmatprep.subr.bf16.mxu1 %v4616_v13  ;;  %v4634_v13 = vld [vmem:[%s5699_s14 + $0x98] sm:$0xff]  }
 0x818   : > { %4365 = vmatmul.mubr.msk.bf16.gmra.mxu1 %vm3048_vm14, %v4605_v38 }
 0x819   : > { %4368 = vmatprep.mubr.msk.bf16.mxu1 %vm4665_vm11, %v4664_v46  ;;  %4226 = vmatpush3.bf16.msra.mxu1 %v4617_v19  ;;  %v4640_v19 = vld [vmem:[%s5699_s14 + $0x80] sm:$0xff]  }
 0x81a   : > { %4227 = vmatprep.subr.bf16.mxu1 %v4618_v24  ;;  %v4643_v24 = vld [vmem:[%s5699_s14 + $0x108] sm:$0xff]  }
 0x81d   : > { %4228 = vmatpush3.bf16.msra.mxu1 %v4619_v25 }
 0x81e   : > { %4229 = vmatprep.subr.bf16.mxu1 %v4620_v26  ;;  %v4644_v26 = vld [vmem:[%s5699_s14 + $0x100] sm:$0xff]  }
 0x820   : > { %4369 = vmatmul.mubr.msk.bf16.gmra.mxu1 %vm3048_vm14, %v4606_v39  ;;  %v3249_v39 = vld [vmem:[#allocation5 + $0x4] sm:$0x1] }
 0x821   : > { %4372 = vmatprep.mubr.msk.bf16.mxu1 %vm4665_vm11, %v4664_v46  ;;  %4230 = vmatpush3.bf16.msra.mxu1 %v4621_v31 }
 0x822   : > { %4231 = vmatprep.subr.bf16.mxu1 %v4622_v33 }
 0x825   : > { %4232 = vmatpush3.bf16.msra.mxu1 %v4623_v36  ;;  %v3325_v36 = vld [vmem:[%s5700_s15] sm:$0x1] }
 0x826   : > { %4239 = vmatprep.subr.bf16.mxu1 %v4625_v47 }
 0x828   : > { %4373 = vmatmul.mubr.msk.bf16.gmra.mxu1 %vm3048_vm14, %v4607_v41 }
 0x8c8   : > { %v3101_v49 = vpop.f32.mrf.mxu1 }
 0x8c9   : > { %v3139_v53 = vpack.c.bf16 %v3101_v49, %v3101_v49 }
 0x8ca   : > { %v4358_v54 = vpop.f32.mrf.mxu1 }
 0x8cb   : > { %v3144_v57 = vsel %vm5513_vm0, %v3139_v53, %v3143_v52 }
 0x8cc   : > { %3145 = vst [vmem:[#allocation5] sm:$0x1] %v3144_v57  ;;  %v3104_v58 = vpop.f32.mrf.mxu1 }
 0x8cd   : > { %v3146_v59 = vpack.c.bf16 %v3104_v58, %v3104_v58 }
 0x8ce   : > { %v4359_v60 = vpop.f32.mrf.mxu1 }
 0x8cf   : > { %v3154_v61 = vrot.slane %v3146_v59, %v5518_v56 }
 0x8d0   : > { %v3109_v0 = vpop.f32.mrf.mxu1 }
 0x8d1   : > { %v3170_v3 = vpack.c.bf16 %v3109_v0, %v3109_v0  ;;  %v3161_v4 = vrot.slane %v3154_v61, %v5518_v56 }
 0x8d2   : > { %v4362_v5 = vpop.f32.mrf.mxu1 }
 0x8d3   : > { %v3172_v7 = vsel %vm5513_vm0, %v3170_v3, %v3171_v2  ;;  %3162 = vrot.lane.b32.xlu0 %v3161_v4, %s4667_s29  ;;  %v3167_v53 = vld [vmem:[#allocation5] sm:$0x1] }
 0x8d4   : > { %3173 = vst [vmem:[#allocation5 + $0x1] sm:$0x1] %v3172_v7  ;;  %v3112_v8 = vpop.f32.mrf.mxu1 }
 0x8d5   : > { %v3174_v9 = vpack.c.bf16 %v3112_v8, %v3112_v8  ;;  %v4627_v8 = vld [vmem:[%s5699_s14 + $0xf0] sm:$0xff]  }
 0x8d6   : > { %v4363_v10 = vpop.f32.mrf.mxu1 }
 0x8d7   : > { %v3182_v40 = vrot.slane %v3174_v9, %v5518_v56  ;;  %v4628_v10 = vld [vmem:[%s5699_s14 + $0xb0] sm:$0xff]  }
 0x8d8   : > { %v3117_v45 = vpop.f32.mrf.mxu1 }
 0x8d9   : > { %v3196_v14 = vpack.c.bf16 %v3117_v45, %v3117_v45  ;;  %v3189_v55 = vrot.slane %v3182_v40, %v5518_v56  ;;  %v4629_v40 = vld [vmem:[%s5699_s14 + $0xe8] sm:$0xff]   ;;  %v4632_v45 = vld [vmem:[%s5699_s14 + $0xa0] sm:$0xff]  }
 0x8da   : > { %v4366_v15 = vpop.f32.mrf.mxu1 }
 0x8db   : > { %v3198_v16 = vsel %vm5513_vm0, %v3196_v14, %v3197_v12  ;;  %3190 = vrot.lane.b32.xlu1 %v3189_v55, %s4667_s29  ;;  %v3193_v57 = vld [vmem:[#allocation5 + $0x1] sm:$0x1]  ;;  %v4633_v12 = vld [vmem:[%s5699_s14 + $0xd8] sm:$0xff]   ;;  %v4637_v15 = vld [vmem:[%s5699_s14 + $0xc8] sm:$0xff]  }
 0x8dc   : > { %3199 = vst [vmem:[#allocation5 + $0x2] sm:$0x1] %v3198_v16  ;;  %v3120_v18 = vpop.f32.mrf.mxu1  ;;  %v4635_v14 = vld [vmem:[%s5699_s14 + $0xd0] sm:$0xff]   ;;  %v4638_v16 = vld [vmem:[%s5699_s14 + $0x88] sm:$0xff]  }
 0x8dd   : > { %v3200_v20 = vpack.c.bf16 %v3120_v18, %v3120_v18  ;;  %v4636_v55 = vld [vmem:[%s5699_s14 + $0x90] sm:$0xff]   ;;  %v4639_v18 = vld [vmem:[%s5699_s14 + $0xc0] sm:$0xff]  }
 0x8de   : > { %v4367_v21 = vpop.f32.mrf.mxu1 }
 0x8df   : > { %v3208_v22 = vrot.slane %v3200_v20, %v5518_v56  ;;  %v4641_v20 = vld [vmem:[%s5699_s14 + $0x118] sm:$0xff]  }
 0x8e0   : > { %v3125_v27 = vpop.f32.mrf.mxu1 }
 0x8e1   : > { %v3222_v29 = vpack.c.bf16 %v3125_v27, %v3125_v27  ;;  %v3215_v23 = vrot.slane %v3208_v22, %v5518_v56  ;;  %v4642_v22 = vld [vmem:[%s5699_s14 + $0x110] sm:$0xff]  }
 0x8e2   : > { %v4370_v30 = vpop.f32.mrf.mxu1 }
 0x8e3   : > { %v3224_v32 = vsel %vm5513_vm0, %v3222_v29, %v3223_v28  ;;  %3216 = vrot.lane.b32.xlu0 %v3215_v23, %s4667_s29  ;;  %v3219_v60 = vld [vmem:[#allocation5 + $0x2] sm:$0x1] }
 0x8e4   : > { %3225 = vst [vmem:[#allocation5 + $0x3] sm:$0x1] %v3224_v32  ;;  %v3128_v34 = vpop.f32.mrf.mxu1 }
 0x8e5   : > { %v3226_v1 = vpack.c.bf16 %v3128_v34, %v3128_v34 }
 0x8e6   : > { %v4371_v35 = vpop.f32.mrf.mxu1 }
 0x8e7   : > { %v3234_v37 = vrot.slane %v3226_v1, %v5518_v56 }
 0x8e8   : > { %v3133_v38 = vpop.f32.mrf.mxu1 }
 0x8e9   : > { %v3241_v41 = vrot.slane %v3234_v37, %v5518_v56  ;;  %v3248_v42 = vpack.c.bf16 %v3133_v38, %v3133_v38 }
 0x8ea   : > { %v4374_v43 = vpop.f32.mrf.mxu1 }
 0x8eb   : > { %3242 = vrot.lane.b32.xlu1 %v3241_v41, %s4667_s29  ;;  %v3250_v44 = vsel %vm5513_vm0, %v3248_v42, %v3249_v39  ;;  %v3245_v63 = vld [vmem:[#allocation5 + $0x3] sm:$0x1] }
 0x8ec   : > { %3251 = vst [vmem:[#allocation5 + $0x4] sm:$0x1] %v3250_v44  ;;  %v3136_v48 = vpop.f32.mrf.mxu1  ;;  %v3711_v44 = vld [vmem:[%s5701_s16] sm:$0x1] }
 0x8ee   : > { %v4375_v49 = vpop.f32.mrf.mxu1 }
 0x8ef   : > { %v3713_v49 = vld [vmem:[%s5702_s17] sm:$0x1] }
 0x945   : > { %v3163_v54 = vpop.permute.xlu0 %3162 }
 0x946   : > { %v3168_v51 = vsel %vm5588_vm2, %v3163_v54, %v3167_v53 }
 0x947   : > { %3169 = vst [vmem:[#allocation5] sm:$0x1] %v3168_v51  ;;  %v3720_v51 = vld [vmem:[#allocation6] sm:$0x1] }
 0x94d   : > { %v3191_v58 = vpop.permute.xlu1 %3190 }
 0x94e   : > { %v3194_v59 = vsel %vm5588_vm2, %v3191_v58, %v3193_v57 }
 0x94f   : > { %3195 = vst [vmem:[#allocation5 + $0x1] sm:$0x1] %v3194_v59 }
 0x955   : > { %v3217_v61 = vpop.permute.xlu0 %3216 }
 0x956   : > { %v3220_v62 = vsel %vm5588_vm2, %v3217_v61, %v3219_v60 }
 0x957   : > { %3221 = vst [vmem:[#allocation5 + $0x2] sm:$0x1] %v3220_v62 }
 0x95d   : > { %v3243_v17 = vpop.permute.xlu1 %3242 }
 0x95e   : > { %v3246_v0 = vsel %vm5588_vm2, %v3243_v17, %v3245_v63 }
 0x95f   : > { %3247 = vst [vmem:[#allocation5 + $0x3] sm:$0x1] %v3246_v0 }
 0x966   : > { %v3252_v2 = vld [vmem:[#allocation5] sm:$0x1f] }
 0x967   : > { %v3334_v3 = vrot.slane %v3252_v2, %v5518_v56  ;;  %v3327_v25 = vcombine.high %v3252_v2, %v3252_v2 }
 0x969   : > { %v3342_v4 = vcombine.high %v3334_v3, %v3334_v3  ;;  %v3349_v7 = vrot.slane %v3334_v3, %v5518_v56  ;;  %v3341_v27 = vrot.slane %v3327_v25, %v5518_v56 }
 0x96b   : > { %v3363_v5 = vrot.slane %v3342_v4, %v5518_v56  ;;  %v3364_v21 = vcombine.high %v3349_v7, %v3349_v7  ;;  %v3356_v28 = vrot.slane %v3341_v27, %v5518_v56 }
 0x96d   : > { %3621 = vmatprep.mubr.bf16.mxu1 %v3363_v5  ;;  %v3365_v9 = vcombine.high %v3363_v5, %v3363_v5 }
 0x96e   : > { %3622 = vmatmul.mubr.bf16.vlgmr.msra.gmra.mxu1 %v3349_v7 }
 0x96f   : > { %4240 = vmatpush3.bf16.msra.mxu1 %v4626_v6  ;;  %3661 = vmatprep.mubr.bf16.mxu1 %v3365_v9 }
 0x970   : > { %4241 = vmatprep.subr.bf16.mxu1 %v4627_v8 }
 0x973   : > { %4242 = vmatpush3.bf16.msra.mxu1 %v4628_v10 }
 0x974   : > { %4243 = vmatprep.subr.bf16.mxu1 %v4629_v40 }
 0x977   : > { %4244 = vmatpush3.bf16.msra.mxu1 %v4630_v11 }
 0x978   : > { %4245 = vmatprep.subr.bf16.mxu1 %v4631_v50 }
 0x97b   : > { %4246 = vmatpush3.bf16.msra.mxu1 %v4632_v45 }
 0x97c   : > { %4247 = vmatprep.subr.bf16.mxu1 %v4633_v12 }
 0x97f   : > { %4248 = vmatpush3.bf16.msra.mxu1 %v4634_v13 }
 0x980   : > { %4249 = vmatprep.subr.bf16.mxu1 %v4635_v14 }
 0x983   : > { %4250 = vmatpush3.bf16.msra.mxu1 %v4636_v55 }
 0x984   : > { %4251 = vmatprep.subr.bf16.mxu1 %v4637_v15 }
 0x987   : > { %4252 = vmatpush3.bf16.msra.mxu1 %v4638_v16 }
 0x988   : > { %4253 = vmatprep.subr.bf16.mxu1 %v4639_v18 }
 0x98b   : > { %4254 = vmatpush3.bf16.msra.mxu1 %v4640_v19 }
 0x98c   : > { %4376 = vmatprep.subr.bf16.mxu1 %v4664_v46 }
 0x98e   : > { %3662 = vmatmul.mubr.bf16.vlgmr.msra.gmra.mxu1 %v3364_v21 }
 0x98f   : > { %4377 = vmatpush3.bf16.msra.mxu1 %v4641_v20  ;;  %4384 = vmatprep.mubr.msk.bf16.mxu1 %vm4665_vm11, %v4664_v46  ;;  %vm3715_vm11 = vcmask 1040384  }
 0x990   : > { %4378 = vmatprep.subr.bf16.mxu1 %v4664_v46 }
 0x993   : > { %4379 = vmatpush3.bf16.msra.mxu1 %v4642_v22 }
 0x994   : > { %4380 = vmatprep.subr.bf16.mxu1 %v4664_v46 }
 0x997   : > { %4381 = vmatpush3.bf16.msra.mxu1 %v4643_v24 }
 0x998   : > { %4382 = vmatprep.subr.bf16.mxu1 %v4664_v46 }
 0x99b   : > { %4383 = vmatpush3.bf16.msra.mxu1 %v4644_v26 }
 0x99e   : > { %4385 = vmatmul.mubr.msk.bf16.vlgmr.msra.gmra.mxu1 %vm2135_vm12, %v3356_v28  ;;  %vm3726_vm12 = vcmask 0  }
 0xa2e   : > { %v4233_v29 = vpop.f32.mrf.mxu1 }
 0xa30   : > { %v4234_v23 = vpop.f32.mrf.mxu1 }
 0xa31   : > { %v4235_v35 = vadd.f32 %v4234_v23, %v4233_v29 }
 0xa32   : > { %v4236_v30 = vpop.f32.mrf.mxu1 }
 0xa33   : > { %v3624_v46 = vadd.f32 %v4235_v35, %v3325_v36 }
 0xa34   : > { %v4237_v31 = vpop.f32.mrf.mxu1 }
 0xa4e   : > { %v4255_v32 = vpop.f32.mrf.mxu1 }
 0xa50   : > { %v4256_v33 = vpop.f32.mrf.mxu1 }
 0xa51   : > { %v4257_v37 = vadd.f32 %v4256_v33, %v4255_v32 }
 0xa52   : > { %v4258_v34 = vpop.f32.mrf.mxu1 }
 0xa53   : > { %v3664_v38 = vadd.f32 %v4257_v37, %v3624_v46 }
 0xa54   : > { %v4259_v1 = vpop.f32.mrf.mxu1 }
 0xa5e   : > { %v3703_v39 = vpop.f32.mrf.mxu1 }
 0xa5f   : > { %v3704_v56 = vadd.f32 %v3703_v39, %v3664_v38 }
 0xa60   : > { %v4386_v41 = vpop.f32.mrf.mxu1 }
 0xa61   : > { %v3709_v42 = vmul.f32 0.2, %v3704_v56 }
 0xa62   : > { %v3706_v43 = vpop.f32.mrf.mxu1 }
 0xa63   : > { %v3710_v47 = vmax.f32 %v3704_v56, %v3709_v42 }
 0xa64   : > { %v4387_v48 = vpop.f32.mrf.mxu1 }
 0xa65   : > { %v3712_v52 = vadd.f32 %v3711_v44, %v3710_v47 }
 0xa67   : > { %v3714_v53 = vmul.f32 %v3713_v49, %v3712_v52 }
 0xa69   : > { %v3716_v54 = vsel %vm3715_vm11, %v3714_v53, 0.0 }
 0xa6a   : > { %3717 = vadd.xlane.f32.xlu0 %v3716_v54 }
 0xaf3   : > { %v3718_v57 = vpop.xlane.xlu0 %3717 }
 0xaf4   : > { %v3721_v58 = vadd.f32 %v3720_v51, %v3718_v57 }
 0xaf6   : > { %v3722_v59 = vmul.f32 0.5, %v3721_v58 }
 0xaf8   : > { %4645 = vtanh.f32 %v3722_v59 }
 0xb05   : > { %v4646_v60 = vpop.eup %4645 }
 0xb06   : > { %v3724_v61 = vadd.f32 1.0, %v4646_v60 }
 0xb08   : > { %v3725_v62 = vmul.f32 0.5, %v3724_v61 }
 0xb0a   : > { %3727 = vst.msk [vmem:[%s600_s28] sm:$0x1] %vm3726_vm12, %v3725_v62 }
 0xb0b PF: > { %s31_s20 = sadd.s32 1, %s4653_s20  }
 0xb0c   : > { %p28_p4 = scmp.ge.s32.totalorder %s31_s20, 4  }
 0xb0e   :  { %30 = sbr.rel (!%p28_p4) target bundleno = 5 (0x5), region = 126 }

</bundles_post_ra>
